<compile_context>
chip_gen: v6e
topology: v6e:2x2x1
jax: 0.10.0
libtpu: 0.0.40
codegen_flags: <defaults>
</compile_context>

<pallas_src>
import jax
import jax.numpy as jnp
from jax.experimental import pallas as pl
from jax.experimental.pallas import tpu as pltpu

EPS = 1e-5
C_TILE = 384  # channel tile: 768 / 384 = 2 grid steps (1 per TC on v7x)


def _bn_kernel(x_ref, gamma_ref, beta_ref, o_ref):
    # x_ref: (C_TILE, L)   gamma_ref/beta_ref: (C_TILE, 1)   o_ref: (C_TILE, L)
    x = x_ref[...]                      # f32 tile
    L = x.shape[-1]
    inv_L = 1.0 / L

    # Single-pass stats; lane-axis reductions go to the XLU/VPU (MXU stays idle).
    s = jnp.sum(x, axis=-1, keepdims=True)          # (C_TILE, 1)
    sq = jnp.sum(x * x, axis=-1, keepdims=True)     # (C_TILE, 1)

    mean = s * inv_L
    var = jnp.maximum(sq * inv_L - mean * mean, 0.0)   # biased var (training BN)
    inv = jax.lax.rsqrt(var + EPS)

    # Fold affine into per-channel scale/shift: y = x * scale + shift
    scale = inv * gamma_ref[...]            # (C_TILE, 1)
    shift = beta_ref[...] - mean * scale    # (C_TILE, 1)

    # Re-read x from VMEM for the normalize pass (keeps vreg pressure low).
    o_ref[...] = (x_ref[...] * scale + shift).astype(o_ref.dtype)


def batchnorm2d(x_nchw, gamma, beta):
    """BatchNorm2d forward with batch statistics (PyTorch training-mode)."""
    N, C, H, W = x_nchw.shape
    assert C % C_TILE == 0, "channel count must be a multiple of C_TILE"
    L = N * H * W

    # VMEM sanity: in-block + out-block, double-buffered, must fit comfortably.
    block_bytes = C_TILE * L * 4
    assert 4 * block_bytes < 24 * 1024 * 1024, "L too large for full-L blocks"
    # TODO(synk): for large L (e.g. N=32, 56x56), tile L with accumulator
    # scratch + pl.when init/finalize instead of full-L blocks.

    if N == 1:
        # NCHW with N == 1 -> (C, H*W): pure reshape, no transpose kernel.
        x2d = x_nchw.reshape(C, L)
    else:
        # TODO(synk): for N > 1, grid over (channel tile, N) with (1, C_TILE, H*W)
        # blocks instead of materializing this transpose (extra HBM round trip).
        x2d = jnp.transpose(x_nchw, (1, 0, 2, 3)).reshape(C, L)

    g2d = gamma.reshape(C, 1).astype(jnp.float32)
    b2d = beta.reshape(C, 1).astype(jnp.float32)

    grid = (C // C_TILE,)
    out2d = pl.pallas_call(
        _bn_kernel,
        out_shape=jax.ShapeDtypeStruct((C, L), x2d.dtype),
        grid_spec=pl.GridSpec(
            grid=grid,
            in_specs=[
                pl.BlockSpec((C_TILE, L), lambda i: (i, 0)),
                pl.BlockSpec((C_TILE, 1), lambda i: (i, 0)),
                pl.BlockSpec((C_TILE, 1), lambda i: (i, 0)),
            ],
            out_specs=pl.BlockSpec((C_TILE, L), lambda i: (i, 0)),
        ),
        compiler_params=pltpu.CompilerParams(
            # Channel tiles are independent -> shard across TCs on v7x.
            dimension_semantics=("parallel",),
        ),
    )(x2d, g2d, b2d)

    if N == 1:
        return out2d.reshape(N, C, H, W)
    return jnp.transpose(out2d.reshape(C, N, H, W), (1, 0, 2, 3))


if __name__ == "__main__":
    key = jax.random.PRNGKey(0)
    N, C, H, W = 1, 768, 14, 14
    x = jax.random.normal(key, (N, C, H, W), dtype=jnp.float32)

    # Deterministic parameter init: PyTorch BatchNorm2d default (weight=1, bias=0)
    gamma = jnp.ones((C,), dtype=jnp.float32)
    beta = jnp.zeros((C,), dtype=jnp.float32)

    out = batchnorm2d(x, gamma, beta)
    out = jax.block_until_ready(out)

    # Reference check (pure JAX, training-mode batch norm)
    mean = jnp.mean(x, axis=(0, 2, 3), keepdims=True)
    var = jnp.mean((x - mean) ** 2, axis=(0, 2, 3), keepdims=True)
    ref = (x - mean) * jax.lax.rsqrt(var + EPS) * gamma.reshape(1, C, 1, 1) + beta.reshape(1, C, 1, 1)
    assert out.shape == (N, C, H, W)
    assert jnp.max(jnp.abs(out - ref)) < 1e-4

    # TODO(synk): running_mean/running_var updates (momentum=0.1, unbiased var)
    # are not produced; only the normalized forward output is computed.
    print("KERNEL_OK")
</pallas_src>

<mosaic_0001>
module attributes {stable_mosaic.version = 11 : i64} {
  func.func @_bn_kernel(%arg0: i32, %arg1: memref<384x196xf32, #tpu.memory_space<vmem>>, %arg2: memref<384x1xf32, #tpu.memory_space<vmem>>, %arg3: memref<384x1xf32, #tpu.memory_space<vmem>>, %arg4: memref<384x196xf32, #tpu.memory_space<vmem>>) attributes {dimension_semantics = [#tpu.dimension_semantics<parallel>], iteration_bounds = array<i64: 2>, scalar_prefetch = 0 : i64, scratch_operands = 0 : i64, tpu.core_type = #tpu.core_type<tc>, window_params = [{transform_indices = @transform_0, window_bounds = array<i64: 384, 196>}, {transform_indices = @transform_1, window_bounds = array<i64: 384, 1>}, {transform_indices = @transform_2, window_bounds = array<i64: 384, 1>}, {transform_indices = @transform_3, window_bounds = array<i64: 384, 196>}]} {
    %c0 = arith.constant 0 : index
    %c0_0 = arith.constant 0 : index
    %0 = vector.load %arg1[%c0, %c0_0] : memref<384x196xf32, #tpu.memory_space<vmem>>, vector<384x196xf32>
    %cst = arith.constant dense<0.000000e+00> : vector<384xf32>
    %1 = vector.multi_reduction <add>, %0, %cst [1] : vector<384x196xf32> to vector<384xf32>
    %2 = vector.shape_cast %1 : vector<384xf32> to vector<384x1xf32>
    %3 = arith.mulf %0, %0 : vector<384x196xf32>
    %cst_1 = arith.constant dense<0.000000e+00> : vector<384xf32>
    %4 = vector.multi_reduction <add>, %3, %cst_1 [1] : vector<384x196xf32> to vector<384xf32>
    %5 = vector.shape_cast %4 : vector<384xf32> to vector<384x1xf32>
    %cst_2 = arith.constant 0.00510204071 : f32
    %6 = vector.broadcast %cst_2 : f32 to vector<384x1xf32>
    %7 = arith.mulf %2, %6 : vector<384x1xf32>
    %cst_3 = arith.constant 0.00510204071 : f32
    %8 = vector.broadcast %cst_3 : f32 to vector<384x1xf32>
    %9 = arith.mulf %5, %8 : vector<384x1xf32>
    %10 = arith.mulf %7, %7 : vector<384x1xf32>
    %11 = arith.subf %9, %10 : vector<384x1xf32>
    %cst_4 = arith.constant 0.000000e+00 : f32
    %12 = vector.broadcast %cst_4 : f32 to vector<384x1xf32>
    %13 = arith.maximumf %11, %12 : vector<384x1xf32>
    %cst_5 = arith.constant 9.99999974E-6 : f32
    %14 = vector.broadcast %cst_5 : f32 to vector<384x1xf32>
    %15 = arith.addf %13, %14 : vector<384x1xf32>
    %16 = math.rsqrt %15 : vector<384x1xf32>
    %c0_6 = arith.constant 0 : index
    %c0_7 = arith.constant 0 : index
    %17 = vector.load %arg2[%c0_6, %c0_7] : memref<384x1xf32, #tpu.memory_space<vmem>>, vector<384x1xf32>
    %18 = arith.mulf %16, %17 : vector<384x1xf32>
    %c0_8 = arith.constant 0 : index
    %c0_9 = arith.constant 0 : index
    %19 = vector.load %arg3[%c0_8, %c0_9] : memref<384x1xf32, #tpu.memory_space<vmem>>, vector<384x1xf32>
    %20 = arith.mulf %7, %18 : vector<384x1xf32>
    %21 = arith.subf %19, %20 : vector<384x1xf32>
    %c0_10 = arith.constant 0 : index
    %c0_11 = arith.constant 0 : index
    %22 = vector.load %arg1[%c0_10, %c0_11] : memref<384x196xf32, #tpu.memory_space<vmem>>, vector<384x196xf32>
    %23 = vector.broadcast %18 : vector<384x1xf32> to vector<384x196xf32>
    %24 = arith.mulf %22, %23 : vector<384x196xf32>
    %25 = vector.broadcast %21 : vector<384x1xf32> to vector<384x196xf32>
    %26 = arith.addf %24, %25 : vector<384x196xf32>
    %c0_12 = arith.constant 0 : index
    %c0_13 = arith.constant 0 : index
    %27 = vector.load %arg4[%c0_12, %c0_13] : memref<384x196xf32, #tpu.memory_space<vmem>>, vector<384x196xf32>
    tpu.vector_store %arg4[%c0_12, %c0_13], %26 {strides = array<i32>} : memref<384x196xf32, #tpu.memory_space<vmem>>, vector<384x196xf32>,
    return
  }
  func.func @transform_0(%arg0: i32) -> (i32, i32) {
    %c0_i32 = arith.constant 0 : i32
    %c0_i32_0 = arith.constant 0 : i32
    return %arg0, %c0_i32 : i32, i32
  }
  func.func @transform_1(%arg0: i32) -> (i32, i32) {
    %c0_i32 = arith.constant 0 : i32
    %c0_i32_0 = arith.constant 0 : i32
    return %arg0, %c0_i32 : i32, i32
  }
  func.func @transform_2(%arg0: i32) -> (i32, i32) {
    %c0_i32 = arith.constant 0 : i32
    %c0_i32_0 = arith.constant 0 : i32
    return %arg0, %c0_i32 : i32, i32
  }
  func.func @transform_3(%arg0: i32) -> (i32, i32) {
    %c0_i32 = arith.constant 0 : i32
    %c0_i32_0 = arith.constant 0 : i32
    return %arg0, %c0_i32 : i32, i32
  }
}

</mosaic_0001>

<bundles_post_ra>
// kernel: tpu_custom_call.1
= control target key start
LH: loop header
LB: loop body
LE: loop exit
PB: predicated region body
PF: predicated region fallthrough
CT: control target
= control target key end

     0   :  { %s2473_s12 = smov 0   ;;  %s4292_s0 = inlined_call_operand.vmem [shape: f32[768,196], index: 0, kind: input, shape index: {}]   ;;  %s4293_s1 = inlined_call_operand.vmem [shape: f32[768,1], index: 1, kind: input, shape index: {}]   ;;  %s4294_s2 = inlined_call_operand.vmem [shape: f32[768,1], index: 2, kind: input, shape index: {}]   ;;  %s4295_s3 = inlined_call_operand.vmem [shape: f32[768,196], index: 3, kind: output, shape index: {}]  }
   0x1 LB: > { %s2226_s13 = sadd.s32 4294967295, %s2450_s12   ;;  %p2230_p0 = scmp.ge.s32.totalorder %s2450_s12, 1  ;;  %s2450_s12 = sphi %s2473_s12, %s13_s12  }
   0x2   : > { %p161_p1 = scmp.lt.s32.totalorder %s2450_s12, 3 }
   0x4   : > { %p162_p2 = pnand %p2230_p0, %p161_p1 }
   0x6   : > { %165 = sbr.rel (%p162_p2) target bundleno = 608 (0x260), region = 32 }
   0xb   : > { %s197_s14 = smul.u32 48, %s2226_s13  ;;  %vm319_vm0 = vcmask 556032  }
   0xd   : > { %p198_p3 = scmp.lt.s32.totalorder %s197_s14, 95 }
   0xf   : > { %s4555_s14 = smov (!%p198_p3, %s197_s14), 95 }
  0x10   : > { %s2239_s15 = sshll.u32 %s4555_s14, 4  ;;  %s2233_s19 = sshll.u32 %s4555_s14, 3 }
  0x11   : > { %s2489_s18 = scalar_lea.vmem %s4292_s0, %s2239_s15  ;;  %s3316_s22 = scalar_lea.vmem %s4293_s1, %s2233_s19 }
  0x12   : > { %v2492_v0 = vld [vmem:[%s2489_s18 + $0x20] sm:$0xff]  ;;  %v2495_v1 = vld [vmem:[%s2489_s18 + $0x28] sm:$0xff]  ;;  %v2506_v5 = vld [vmem:[%s2489_s18 + $0x30] sm:$0xff]  ;;  %s3683_s25 = scalar_lea.vmem %s4294_s2, %s2233_s19  ;;  %s3949_s28 = scalar_lea.vmem %s4295_s3, %s2239_s15 }
  0x13   : > { %v2498_v2 = vld [vmem:[%s2489_s18] sm:$0xff]  ;;  %v328_v3 = vsel %vm319_vm0, %v2495_v1, 0.0  ;;  %v2503_v4 = vld [vmem:[%s2489_s18 + $0x8] sm:$0xff]  ;;  %v2509_v6 = vld [vmem:[%s2489_s18 + $0x38] sm:$0xff] }
  0x14   : > { %v329_v7 = vadd.f32 %v328_v3, %v2492_v0  ;;  %v320_v8 = vsel %vm319_vm0, %v2503_v4, 0.0  ;;  %v332_v9 = vsel %vm319_vm0, %v2509_v6, 0.0  ;;  %v2517_v10 = vld [vmem:[%s2489_s18 + $0x10] sm:$0xff]  ;;  %v2520_v11 = vld [vmem:[%s2489_s18 + $0x18] sm:$0xff]  ;;  %v2529_v15 = vld [vmem:[%s2489_s18 + $0x48] sm:$0xff] }
  0x15   : > { %v321_v12 = vadd.f32 %v320_v8, %v2498_v2  ;;  %v324_v13 = vsel %vm319_vm0, %v2520_v11, 0.0  ;;  %v2526_v14 = vld [vmem:[%s2489_s18 + $0x58] sm:$0xff]  ;;  %v333_v16 = vadd.f32 %v332_v9, %v2506_v5  ;;  %v2534_v18 = vld [vmem:[%s2489_s18 + $0x50] sm:$0xff]  ;;  %v2539_v20 = vld [vmem:[%s2489_s18 + $0x40] sm:$0xff]  ;;  %v336_v21 = vsel %vm319_vm0, %v2529_v15, 0.0 }
  0x16   : > { %330 = vadd.xlane.f32.xlu1 %v329_v7  ;;  %v325_v17 = vadd.f32 %v324_v13, %v2517_v10  ;;  %v340_v19 = vsel %vm319_vm0, %v2526_v14, 0.0  ;;  %v2544_v22 = vld [vmem:[%s2489_s18 + $0x78] sm:$0xff]  ;;  %v2547_v23 = vld [vmem:[%s2489_s18 + $0x68] sm:$0xff]  ;;  %v337_v25 = vadd.f32 %v336_v21, %v2539_v20  ;;  %v2552_v26 = vld [vmem:[%s2489_s18 + $0x70] sm:$0xff] }
  0x17   : > { %322 = vadd.xlane.f32.xlu0 %v321_v12  ;;  %v341_v24 = vadd.f32 %v340_v19, %v2534_v18  ;;  %v348_v27 = vsel %vm319_vm0, %v2544_v22, 0.0  ;;  %v2557_v28 = vld [vmem:[%s2489_s18 + $0x60] sm:$0xff]  ;;  %v344_v29 = vsel %vm319_vm0, %v2547_v23, 0.0  ;;  %v2562_v30 = vld [vmem:[%s2489_s18 + $0x98] sm:$0xff]  ;;  %v2565_v31 = vld [vmem:[%s2489_s18 + $0x88] sm:$0xff] }
  0x18   : > { %v349_v32 = vadd.f32 %v348_v27, %v2552_v26  ;;  %v345_v33 = vadd.f32 %v344_v29, %v2557_v28  ;;  %v2570_v34 = vld [vmem:[%s2489_s18 + $0x90] sm:$0xff]  ;;  %v356_v35 = vsel %vm319_vm0, %v2562_v30, 0.0  ;;  %v2575_v36 = vld [vmem:[%s2489_s18 + $0x80] sm:$0xff]  ;;  %v352_v37 = vsel %vm319_vm0, %v2565_v31, 0.0  ;;  %v2580_v38 = vld [vmem:[%s2489_s18 + $0xb8] sm:$0xff] }
  0x19   : > { %v2583_v39 = vld [vmem:[%s2489_s18 + $0xa8] sm:$0xff]  ;;  %v357_v40 = vadd.f32 %v356_v35, %v2570_v34  ;;  %v353_v41 = vadd.f32 %v352_v37, %v2575_v36  ;;  %v2588_v42 = vld [vmem:[%s2489_s18 + $0xb0] sm:$0xff]  ;;  %v364_v43 = vsel %vm319_vm0, %v2580_v38, 0.0  ;;  %v2593_v44 = vld [vmem:[%s2489_s18 + $0xa0] sm:$0xff] }
  0x1a   : > { %334 = vadd.xlane.f32.xlu1 %v333_v16  ;;  %v360_v45 = vsel %vm319_vm0, %v2583_v39, 0.0  ;;  %v2598_v46 = vld [vmem:[%s2489_s18 + $0xd8] sm:$0xff]  ;;  %v2601_v47 = vld [vmem:[%s2489_s18 + $0xc8] sm:$0xff]  ;;  %v365_v48 = vadd.f32 %v364_v43, %v2588_v42  ;;  %v2606_v50 = vld [vmem:[%s2489_s18 + $0xd0] sm:$0xff] }
  0x1b   : > { %326 = vadd.xlane.f32.xlu0 %v325_v17  ;;  %v361_v49 = vadd.f32 %v360_v45, %v2593_v44  ;;  %v372_v51 = vsel %vm319_vm0, %v2598_v46, 0.0  ;;  %v2611_v52 = vld [vmem:[%s2489_s18 + $0xc0] sm:$0xff]  ;;  %v368_v53 = vsel %vm319_vm0, %v2601_v47, 0.0  ;;  %v2616_v54 = vld [vmem:[%s2489_s18 + $0xf8] sm:$0xff]  ;;  %v2619_v55 = vld [vmem:[%s2489_s18 + $0xe8] sm:$0xff] }
  0x1c   : > { %v373_v56 = vadd.f32 %v372_v51, %v2606_v50  ;;  %v369_v57 = vadd.f32 %v368_v53, %v2611_v52  ;;  %v2624_v58 = vld [vmem:[%s2489_s18 + $0xf0] sm:$0xff]  ;;  %v380_v59 = vsel %vm319_vm0, %v2616_v54, 0.0  ;;  %v2629_v60 = vld [vmem:[%s2489_s18 + $0xe0] sm:$0xff]  ;;  %v376_v61 = vsel %vm319_vm0, %v2619_v55, 0.0  ;;  %v2634_v62 = vld [vmem:[%s2489_s18 + $0x118] sm:$0xff] }
  0x1d   : > { %v2637_v63 = vld [vmem:[%s2489_s18 + $0x108] sm:$0xff]  ;;  %v381_v3 = vadd.f32 %v380_v59, %v2624_v58  ;;  %v377_v7 = vadd.f32 %v376_v61, %v2629_v60  ;;  %v2642_v8 = vld [vmem:[%s2489_s18 + $0x110] sm:$0xff]  ;;  %v388_v9 = vsel %vm319_vm0, %v2634_v62, 0.0  ;;  %v2647_v12 = vld [vmem:[%s2489_s18 + $0x100] sm:$0xff] }
  0x1e   : > { %342 = vadd.xlane.f32.xlu1 %v341_v24  ;;  %v384_v13 = vsel %vm319_vm0, %v2637_v63, 0.0  ;;  %v2652_v16 = vld [vmem:[%s2489_s18 + $0x138] sm:$0xff]  ;;  %v2655_v17 = vld [vmem:[%s2489_s18 + $0x128] sm:$0xff]  ;;  %v389_v19 = vadd.f32 %v388_v9, %v2642_v8  ;;  %v2660_v24 = vld [vmem:[%s2489_s18 + $0x130] sm:$0xff] }
  0x1f   : > { %338 = vadd.xlane.f32.xlu0 %v337_v25  ;;  %v385_v21 = vadd.f32 %v384_v13, %v2647_v12  ;;  %v396_v25 = vsel %vm319_vm0, %v2652_v16, 0.0  ;;  %v2665_v27 = vld [vmem:[%s2489_s18 + $0x120] sm:$0xff]  ;;  %v392_v29 = vsel %vm319_vm0, %v2655_v17, 0.0 }
  0x20   : > { %v397_v35 = vadd.f32 %v396_v25, %v2660_v24  ;;  %v393_v37 = vadd.f32 %v392_v29, %v2665_v27  ;;  %v2683_v43 = vld [vmem:[%s2489_s18 + $0x140] sm:$0xff] }
  0x21   : > { %v2701_v59 = vld [vmem:[%s2489_s18 + $0x160] sm:$0xff] }
  0x22   : > { %350 = vadd.xlane.f32.xlu1 %v349_v32  ;;  %v2670_v32 = vld [vmem:[%s2489_s18 + $0x158] sm:$0xff]  ;;  %v2719_v25 = vld [vmem:[%s2489_s18 + $0x180] sm:$0xff] }
  0x23   : > { %346 = vadd.xlane.f32.xlu0 %v345_v33  ;;  %v2673_v33 = vld [vmem:[%s2489_s18 + $0x148] sm:$0xff]  ;;  %4385 = vst [vmem:[#allocation5_spill] sm:$0xff] %v2719_v25 }
  0x24   : > { %v400_v45 = vsel %vm319_vm0, %v2673_v33, 0.0 }
  0x25   : > { %v401_v53 = vadd.f32 %v400_v45, %v2683_v43 }
  0x26   : > { %358 = vadd.xlane.f32.xlu1 %v357_v40  ;;  %v2678_v40 = vld [vmem:[%s2489_s18 + $0x150] sm:$0xff] }
  0x27   : > { %354 = vadd.xlane.f32.xlu0 %v353_v41  ;;  %v404_v41 = vsel %vm319_vm0, %v2670_v32, 0.0 }
  0x28   : > { %v405_v51 = vadd.f32 %v404_v41, %v2678_v40 }
  0x2a   : > { %366 = vadd.xlane.f32.xlu1 %v365_v48  ;;  %v2688_v48 = vld [vmem:[%s2489_s18 + $0x178] sm:$0xff] }
  0x2b   : > { %362 = vadd.xlane.f32.xlu0 %v361_v49  ;;  %v2691_v49 = vld [vmem:[%s2489_s18 + $0x168] sm:$0xff] }
  0x2c   : > { %v408_v61 = vsel %vm319_vm0, %v2691_v49, 0.0 }
  0x2d   : > { %v409_v13 = vadd.f32 %v408_v61, %v2701_v59 }
  0x2e   : > { %374 = vadd.xlane.f32.xlu1 %v373_v56  ;;  %v2696_v56 = vld [vmem:[%s2489_s18 + $0x170] sm:$0xff] }
  0x2f   : > { %370 = vadd.xlane.f32.xlu0 %v369_v57  ;;  %v412_v57 = vsel %vm319_vm0, %v2688_v48, 0.0 }
  0x30   : > { %v413_v9 = vadd.f32 %v412_v57, %v2696_v56  ;;  %v2737_v57 = vld [vmem:[%s2489_s18 + $0x1a0] sm:$0xff] }
  0x31   : > { %4389 = vst [vmem:[#allocation9_spill] sm:$0xff] %v2737_v57 }
  0x32   : > { %382 = vadd.xlane.f32.xlu1 %v381_v3  ;;  %v2706_v3 = vld [vmem:[%s2489_s18 + $0x198] sm:$0xff] }
  0x33   : > { %378 = vadd.xlane.f32.xlu0 %v377_v7  ;;  %4382 = vst [vmem:[#allocation2_spill] sm:$0xff] %v2706_v3  ;;  %v2709_v7 = vld [vmem:[%s2489_s18 + $0x188] sm:$0xff] }
  0x34   : > { %4383 = vst [vmem:[#allocation3_spill] sm:$0xff] %v2709_v7  ;;  %v416_v29 = vsel %vm319_vm0, %v2709_v7, 0.0  ;;  %v2742_v7 = vld [vmem:[%s2489_s18 + $0x1d8] sm:$0xff] }
  0x35   : > { %v417_v45 = vadd.f32 %v416_v29, %v2719_v25  ;;  %4390 = vst [vmem:[#allocation10_spill] sm:$0xff] %v2742_v7  ;;  %v2750_v29 = vld [vmem:[%s2489_s18 + $0x1d0] sm:$0xff] }
  0x36   : > { %390 = vadd.xlane.f32.xlu1 %v389_v19  ;;  %v2714_v19 = vld [vmem:[%s2489_s18 + $0x190] sm:$0xff]  ;;  %4392 = vst [vmem:[#allocation12_spill] sm:$0xff] %v2750_v29 }
  0x37   : > { %386 = vadd.xlane.f32.xlu0 %v385_v21  ;;  %4384 = vst [vmem:[#allocation4_spill] sm:$0xff] %v2714_v19  ;;  %v420_v21 = vsel %vm319_vm0, %v2706_v3, 0.0  ;;  %v2907_v3 = vld [vmem:[%s2489_s18 + $0x2e8] sm:$0xff] }
  0x38   : > { %v421_v41 = vadd.f32 %v420_v21, %v2714_v19  ;;  %v2760_v19 = vld [vmem:[%s2489_s18 + $0x1f8] sm:$0xff]  ;;  %4425 = vst [vmem:[#allocation45_spill] sm:$0xff] %v2907_v3 }
  0x39   : > { %4394 = vst [vmem:[#allocation14_spill] sm:$0xff] %v2760_v19 }
  0x3a   : > { %398 = vadd.xlane.f32.xlu1 %v397_v35  ;;  %v2724_v35 = vld [vmem:[%s2489_s18 + $0x1b8] sm:$0xff] }
  0x3b   : > { %394 = vadd.xlane.f32.xlu0 %v393_v37  ;;  %4386 = vst [vmem:[#allocation6_spill] sm:$0xff] %v2724_v35  ;;  %v2727_v37 = vld [vmem:[%s2489_s18 + $0x1a8] sm:$0xff] }
  0x3c   : > { %4387 = vst [vmem:[#allocation7_spill] sm:$0xff] %v2727_v37  ;;  %v424_v61 = vsel %vm319_vm0, %v2727_v37, 0.0  ;;  %v2755_v37 = vld [vmem:[%s2489_s18 + $0x1c0] sm:$0xff] }
  0x3d   : > { %v425_v21 = vadd.f32 %v424_v61, %v2737_v57  ;;  %4393 = vst [vmem:[#allocation13_spill] sm:$0xff] %v2755_v37  ;;  %v2768_v61 = vld [vmem:[%s2489_s18 + $0x1f0] sm:$0xff] }
  0x3e   : > { %406 = vadd.xlane.f32.xlu1 %v405_v51  ;;  %v2732_v51 = vld [vmem:[%s2489_s18 + $0x1b0] sm:$0xff]  ;;  %4396 = vst [vmem:[#allocation16_spill] sm:$0xff] %v2768_v61 }
  0x3f   : > { %402 = vadd.xlane.f32.xlu0 %v401_v53  ;;  %4388 = vst [vmem:[#allocation8_spill] sm:$0xff] %v2732_v51  ;;  %v428_v53 = vsel %vm319_vm0, %v2724_v35, 0.0  ;;  %v436_v35 = vsel %vm319_vm0, %v2742_v7, 0.0  ;;  %v444_v7 = vsel %vm319_vm0, %v2760_v19, 0.0 }
  0x42   : > { %414 = vadd.xlane.f32.xlu1 %v413_v9  ;;  %v2745_v9 = vld [vmem:[%s2489_s18 + $0x1c8] sm:$0xff] }
  0x43   : > { %410 = vadd.xlane.f32.xlu0 %v409_v13  ;;  %4391 = vst [vmem:[#allocation11_spill] sm:$0xff] %v2745_v9  ;;  %v429_v13 = vadd.f32 %v428_v53, %v2732_v51  ;;  %v432_v25 = vsel %vm319_vm0, %v2745_v9, 0.0  ;;  %v2773_v9 = vld [vmem:[%s2489_s18 + $0x1e0] sm:$0xff]  ;;  %v2778_v51 = vld [vmem:[%s2489_s18 + $0x218] sm:$0xff] }
  0x44   : > { %v433_v53 = vadd.f32 %v432_v25, %v2755_v37  ;;  %4397 = vst [vmem:[#allocation17_spill] sm:$0xff] %v2773_v9  ;;  %4398 = vst [vmem:[#allocation18_spill] sm:$0xff] %v2778_v51  ;;  %v445_v25 = vadd.f32 %v444_v7, %v2768_v61  ;;  %v452_v19 = vsel %vm319_vm0, %v2778_v51, 0.0  ;;  %v2814_v61 = vld [vmem:[%s2489_s18 + $0x258] sm:$0xff] }
  0x45   : > { %4406 = vst [vmem:[#allocation26_spill] sm:$0xff] %v2814_v61 }
  0x46   : > { %422 = vadd.xlane.f32.xlu1 %v421_v41  ;;  %v2763_v41 = vld [vmem:[%s2489_s18 + $0x1e8] sm:$0xff] }
  0x47   : > { %418 = vadd.xlane.f32.xlu0 %v417_v45  ;;  %4395 = vst [vmem:[#allocation15_spill] sm:$0xff] %v2763_v41  ;;  %v437_v45 = vadd.f32 %v436_v35, %v2750_v29  ;;  %v440_v57 = vsel %vm319_vm0, %v2763_v41, 0.0  ;;  %v2791_v41 = vld [vmem:[%s2489_s18 + $0x200] sm:$0xff]  ;;  %v2796_v29 = vld [vmem:[%s2489_s18 + $0x238] sm:$0xff] }
  0x48   : > { %v441_v35 = vadd.f32 %v440_v57, %v2773_v9  ;;  %4401 = vst [vmem:[#allocation21_spill] sm:$0xff] %v2791_v41  ;;  %4402 = vst [vmem:[#allocation22_spill] sm:$0xff] %v2796_v29  ;;  %v460_v51 = vsel %vm319_vm0, %v2796_v29, 0.0  ;;  %v468_v29 = vsel %vm319_vm0, %v2814_v61, 0.0 }
  0x4a   : > { %430 = vadd.xlane.f32.xlu1 %v429_v13  ;;  %v2781_v13 = vld [vmem:[%s2489_s18 + $0x208] sm:$0xff] }
  0x4b   : > { %426 = vadd.xlane.f32.xlu0 %v425_v21  ;;  %4399 = vst [vmem:[#allocation19_spill] sm:$0xff] %v2781_v13  ;;  %v2786_v21 = vld [vmem:[%s2489_s18 + $0x210] sm:$0xff]  ;;  %v448_v37 = vsel %vm319_vm0, %v2781_v13, 0.0  ;;  %v2809_v13 = vld [vmem:[%s2489_s18 + $0x220] sm:$0xff] }
  0x4c   : > { %4400 = vst [vmem:[#allocation20_spill] sm:$0xff] %v2786_v21  ;;  %v453_v7 = vadd.f32 %v452_v19, %v2786_v21  ;;  %v449_v57 = vadd.f32 %v448_v37, %v2791_v41  ;;  %4405 = vst [vmem:[#allocation25_spill] sm:$0xff] %v2809_v13  ;;  %v2832_v21 = vld [vmem:[%s2489_s18 + $0x278] sm:$0xff] }
  0x4d   : > { %4410 = vst [vmem:[#allocation30_spill] sm:$0xff] %v2832_v21  ;;  %v476_v61 = vsel %vm319_vm0, %v2832_v21, 0.0 }
  0x4e   : > { %438 = vadd.xlane.f32.xlu1 %v437_v45  ;;  %v2799_v45 = vld [vmem:[%s2489_s18 + $0x228] sm:$0xff] }
  0x4f   : > { %434 = vadd.xlane.f32.xlu0 %v433_v53  ;;  %4403 = vst [vmem:[#allocation23_spill] sm:$0xff] %v2799_v45  ;;  %v2804_v53 = vld [vmem:[%s2489_s18 + $0x230] sm:$0xff]  ;;  %v456_v9 = vsel %vm319_vm0, %v2799_v45, 0.0  ;;  %v2827_v45 = vld [vmem:[%s2489_s18 + $0x240] sm:$0xff] }
  0x50   : > { %4404 = vst [vmem:[#allocation24_spill] sm:$0xff] %v2804_v53  ;;  %v461_v19 = vadd.f32 %v460_v51, %v2804_v53  ;;  %v457_v37 = vadd.f32 %v456_v9, %v2809_v13  ;;  %4409 = vst [vmem:[#allocation29_spill] sm:$0xff] %v2827_v45  ;;  %v2850_v53 = vld [vmem:[%s2489_s18 + $0x298] sm:$0xff] }
  0x51   : > { %4414 = vst [vmem:[#allocation34_spill] sm:$0xff] %v2850_v53  ;;  %v484_v21 = vsel %vm319_vm0, %v2850_v53, 0.0 }
  0x52   : > { %446 = vadd.xlane.f32.xlu1 %v445_v25  ;;  %v2817_v25 = vld [vmem:[%s2489_s18 + $0x248] sm:$0xff] }
  0x53   : > { %442 = vadd.xlane.f32.xlu0 %v441_v35  ;;  %4407 = vst [vmem:[#allocation27_spill] sm:$0xff] %v2817_v25  ;;  %v2822_v35 = vld [vmem:[%s2489_s18 + $0x250] sm:$0xff]  ;;  %v464_v41 = vsel %vm319_vm0, %v2817_v25, 0.0  ;;  %v2845_v25 = vld [vmem:[%s2489_s18 + $0x260] sm:$0xff] }
  0x54   : > { %4408 = vst [vmem:[#allocation28_spill] sm:$0xff] %v2822_v35  ;;  %v469_v51 = vadd.f32 %v468_v29, %v2822_v35  ;;  %v465_v9 = vadd.f32 %v464_v41, %v2827_v45  ;;  %4413 = vst [vmem:[#allocation33_spill] sm:$0xff] %v2845_v25  ;;  %v2868_v35 = vld [vmem:[%s2489_s18 + $0x2b8] sm:$0xff] }
  0x55   : > { %4418 = vst [vmem:[#allocation38_spill] sm:$0xff] %v2868_v35  ;;  %v492_v53 = vsel %vm319_vm0, %v2868_v35, 0.0 }
  0x56   : > { %454 = vadd.xlane.f32.xlu1 %v453_v7  ;;  %v2835_v7 = vld [vmem:[%s2489_s18 + $0x268] sm:$0xff] }
  0x57   : > { %450 = vadd.xlane.f32.xlu0 %v449_v57  ;;  %4411 = vst [vmem:[#allocation31_spill] sm:$0xff] %v2835_v7  ;;  %v2840_v57 = vld [vmem:[%s2489_s18 + $0x270] sm:$0xff]  ;;  %v472_v13 = vsel %vm319_vm0, %v2835_v7, 0.0  ;;  %v2863_v7 = vld [vmem:[%s2489_s18 + $0x280] sm:$0xff] }
  0x58   : > { %4412 = vst [vmem:[#allocation32_spill] sm:$0xff] %v2840_v57  ;;  %v477_v29 = vadd.f32 %v476_v61, %v2840_v57  ;;  %v473_v41 = vadd.f32 %v472_v13, %v2845_v25  ;;  %4417 = vst [vmem:[#allocation37_spill] sm:$0xff] %v2863_v7  ;;  %v2886_v57 = vld [vmem:[%s2489_s18 + $0x2d8] sm:$0xff] }
  0x59   : > { %4421 = vst [vmem:[#allocation41_spill] sm:$0xff] %v2886_v57  ;;  %v500_v35 = vsel %vm319_vm0, %v2886_v57, 0.0  ;;  %v515_v57 = vmul.f32 %v2520_v11, %v2520_v11  ;;  %v512_v11 = vmul.f32 %v2498_v2, %v2498_v2  ;;  %v516_v2 = vmul.f32 %v2492_v0, %v2492_v0 }
  0x5a   : > { %462 = vadd.xlane.f32.xlu1 %v461_v19  ;;  %v2853_v19 = vld [vmem:[%s2489_s18 + $0x288] sm:$0xff]  ;;  %v520_v0 = vmul.f32 %v2539_v20, %v2539_v20  ;;  %v524_v20 = vmul.f32 %v2557_v28, %v2557_v28  ;;  %v528_v28 = vmul.f32 %v2575_v36, %v2575_v36  ;;  %v532_v36 = vmul.f32 %v2593_v44, %v2593_v44 }
  0x5b   : > { %458 = vadd.xlane.f32.xlu0 %v457_v37  ;;  %4415 = vst [vmem:[#allocation35_spill] sm:$0xff] %v2853_v19  ;;  %v2858_v37 = vld [vmem:[%s2489_s18 + $0x290] sm:$0xff]  ;;  %v480_v45 = vsel %vm319_vm0, %v2853_v19, 0.0  ;;  %v2881_v19 = vld [vmem:[%s2489_s18 + $0x2a0] sm:$0xff]  ;;  %v536_v44 = vmul.f32 %v2611_v52, %v2611_v52  ;;  %v540_v52 = vmul.f32 %v2629_v60, %v2629_v60  ;;  %v544_v60 = vmul.f32 %v2647_v12, %v2647_v12 }
  0x5c   : > { %4416 = vst [vmem:[#allocation36_spill] sm:$0xff] %v2858_v37  ;;  %v485_v61 = vadd.f32 %v484_v21, %v2858_v37  ;;  %v481_v13 = vadd.f32 %v480_v45, %v2863_v7  ;;  %4420 = vst [vmem:[#allocation40_spill] sm:$0xff] %v2881_v19  ;;  %v2899_v7 = vld [vmem:[%s2489_s18 + $0x2c0] sm:$0xff]  ;;  %v2904_v37 = vld [vmem:[%s2489_s18 + $0x2f8] sm:$0xff]  ;;  %v548_v12 = vmul.f32 %v2665_v27, %v2665_v27 }
  0x5d   : > { %4423 = vst [vmem:[#allocation43_spill] sm:$0xff] %v2899_v7  ;;  %4424 = vst [vmem:[#allocation44_spill] sm:$0xff] %v2904_v37 }
  0x5e   : > { %470 = vadd.xlane.f32.xlu1 %v469_v51  ;;  %v2871_v51 = vld [vmem:[%s2489_s18 + $0x2a8] sm:$0xff] }
  0x5f   : > { %466 = vadd.xlane.f32.xlu0 %v465_v9  ;;  %4419 = vst [vmem:[#allocation39_spill] sm:$0xff] %v2871_v51  ;;  %v2876_v9 = vld [vmem:[%s2489_s18 + $0x2b0] sm:$0xff]  ;;  %v488_v25 = vsel %vm319_vm0, %v2871_v51, 0.0 }
  0x60   : > { %v493_v21 = vadd.f32 %v492_v53, %v2876_v9  ;;  %v489_v45 = vadd.f32 %v488_v25, %v2881_v19  ;;  %v2919_v19 = vld [vmem:[%s2489_s18 + $0x2e0] sm:$0xff] }
  0x62   : > { %478 = vadd.xlane.f32.xlu1 %v477_v29  ;;  %v2889_v29 = vld [vmem:[%s2489_s18 + $0x2c8] sm:$0xff] }
  0x63   : > { %474 = vadd.xlane.f32.xlu0 %v473_v41  ;;  %4422 = vst [vmem:[#allocation42_spill] sm:$0xff] %v2889_v29  ;;  %v2894_v41 = vld [vmem:[%s2489_s18 + $0x2d0] sm:$0xff]  ;;  %v496_v51 = vsel %vm319_vm0, %v2889_v29, 0.0  ;;  %v504_v29 = vsel %vm319_vm0, %v2907_v3, 0.0  ;;  %v519_v3 = vmul.f32 %v2509_v6, %v2509_v6  ;;  %v523_v6 = vmul.f32 %v2526_v14, %v2526_v14 }
  0x64   : > { %v501_v53 = vadd.f32 %v500_v35, %v2894_v41  ;;  %v497_v25 = vadd.f32 %v496_v51, %v2899_v7  ;;  %v514_v51 = vmul.f32 %v2517_v10, %v2517_v10  ;;  %v518_v10 = vmul.f32 %v2506_v5, %v2506_v5 }
  0x65   : > { %v522_v5 = vmul.f32 %v2534_v18, %v2534_v18  ;;  %v527_v14 = vmul.f32 %v2544_v22, %v2544_v22  ;;  %v526_v18 = vmul.f32 %v2552_v26, %v2552_v26  ;;  %v531_v22 = vmul.f32 %v2562_v30, %v2562_v30 }
  0x66   : > { %486 = vadd.xlane.f32.xlu1 %v485_v61  ;;  %v2912_v61 = vld [vmem:[%s2489_s18 + $0x2f0] sm:$0xff]  ;;  %v530_v26 = vmul.f32 %v2570_v34, %v2570_v34  ;;  %v535_v30 = vmul.f32 %v2580_v38, %v2580_v38  ;;  %v534_v34 = vmul.f32 %v2588_v42, %v2588_v42  ;;  %v539_v38 = vmul.f32 %v2598_v46, %v2598_v46 }
  0x67   : > { %482 = vadd.xlane.f32.xlu0 %v481_v13  ;;  %v508_v13 = vsel %vm319_vm0, %v2904_v37, 0.0  ;;  %v612_v37 = vsel %vm319_vm0, %v515_v57, 0.0  ;;  %v620_v57 = vsel %vm319_vm0, %v519_v3, 0.0  ;;  %v628_v3 = vsel %vm319_vm0, %v523_v6, 0.0 }
  0x68   : > { %v509_v35 = vadd.f32 %v508_v13, %v2912_v61  ;;  %v538_v42 = vmul.f32 %v2606_v50, %v2606_v50  ;;  %v543_v46 = vmul.f32 %v2616_v54, %v2616_v54  ;;  %v542_v50 = vmul.f32 %v2624_v58, %v2624_v58 }
  0x69   : > { %v547_v54 = vmul.f32 %v2634_v62, %v2634_v62  ;;  %v546_v58 = vmul.f32 %v2642_v8, %v2642_v8  ;;  %v551_v62 = vmul.f32 %v2652_v16, %v2652_v16  ;;  %v550_v8 = vmul.f32 %v2660_v24, %v2660_v24 }
  0x6a   : > { %494 = vadd.xlane.f32.xlu1 %v493_v21  ;;  %v513_v21 = vmul.f32 %v2503_v4, %v2503_v4  ;;  %v517_v4 = vmul.f32 %v2495_v1, %v2495_v1  ;;  %v521_v1 = vmul.f32 %v2529_v15, %v2529_v15  ;;  %v525_v15 = vmul.f32 %v2547_v23, %v2547_v23 }
  0x6b   : > { %490 = vadd.xlane.f32.xlu0 %v489_v45  ;;  %v505_v45 = vadd.f32 %v504_v29, %v2919_v19  ;;  %v529_v23 = vmul.f32 %v2565_v31, %v2565_v31  ;;  %v533_v31 = vmul.f32 %v2583_v39, %v2583_v39  ;;  %v537_v39 = vmul.f32 %v2601_v47, %v2601_v47 }
  0x6c   : > { %v608_v7 = vsel %vm319_vm0, %v513_v21, 0.0  ;;  %v624_v13 = vsel %vm319_vm0, %v521_v1, 0.0  ;;  %v629_v21 = vadd.f32 %v628_v3, %v522_v5  ;;  %v541_v47 = vmul.f32 %v2619_v55, %v2619_v55 }
  0x6d   : > { %v609_v29 = vadd.f32 %v608_v7, %v512_v11  ;;  %v648_v6 = vsel %vm319_vm0, %v533_v31, 0.0  ;;  %v656_v5 = vsel %vm319_vm0, %v537_v39, 0.0  ;;  %v545_v55 = vmul.f32 %v2637_v63, %v2637_v63  ;;  %v4427_v31 = vld [vmem:[#allocation3_spill] sm:$0xff]  ;;  %v4430_v39 = vld [vmem:[#allocation6_spill] sm:$0xff] }
  0x6e   : > { %502 = vadd.xlane.f32.xlu1 %v501_v53  ;;  %v613_v53 = vadd.f32 %v612_v37, %v514_v51  ;;  %v621_v37 = vadd.f32 %v620_v57, %v518_v10  ;;  %v636_v51 = vsel %vm319_vm0, %v527_v14, 0.0  ;;  %v640_v10 = vsel %vm319_vm0, %v529_v23, 0.0 }
  0x6f   : > { %498 = vadd.xlane.f32.xlu0 %v497_v25  ;;  %v616_v25 = vsel %vm319_vm0, %v517_v4, 0.0  ;;  %v637_v11 = vadd.f32 %v636_v51, %v526_v18  ;;  %v641_v57 = vadd.f32 %v640_v10, %v528_v28  ;;  %v649_v1 = vadd.f32 %v648_v6, %v532_v36 }
  0x70   : > { %v617_v7 = vadd.f32 %v616_v25, %v516_v2  ;;  %v652_v2 = vsel %vm319_vm0, %v535_v30, 0.0  ;;  %v657_v3 = vadd.f32 %v656_v5, %v536_v44  ;;  %v664_v14 = vsel %vm319_vm0, %v541_v47, 0.0  ;;  %v4426_v30 = vld [vmem:[#allocation2_spill] sm:$0xff]  ;;  %v4432_v5 = vld [vmem:[#allocation8_spill] sm:$0xff] }
  0x71   : > { %v653_v25 = vadd.f32 %v652_v2, %v534_v34  ;;  %v672_v18 = vsel %vm319_vm0, %v545_v55, 0.0  ;;  %v549_v63 = vmul.f32 %v2655_v17, %v2655_v17  ;;  %v555_v16 = vmul.f32 %v2670_v32, %v2670_v32 }
  0x72   : > { %510 = vadd.xlane.f32.xlu1 %v509_v35  ;;  %v625_v35 = vadd.f32 %v624_v13, %v520_v0  ;;  %v668_v0 = vsel %vm319_vm0, %v543_v46, 0.0  ;;  %v673_v51 = vadd.f32 %v672_v18, %v544_v60  ;;  %v553_v17 = vmul.f32 %v2673_v33, %v2673_v33  ;;  %v4436_v60 = vld [vmem:[#allocation12_spill] sm:$0xff] }
  0x73   : > { %506 = vadd.xlane.f32.xlu0 %v505_v45  ;;  %v632_v45 = vsel %vm319_vm0, %v525_v15, 0.0  ;;  %v669_v13 = vadd.f32 %v668_v0, %v542_v50  ;;  %v665_v15 = vadd.f32 %v664_v14, %v540_v52  ;;  %v554_v24 = vmul.f32 %v2678_v40, %v2678_v40  ;;  %v4433_v0 = vld [vmem:[#allocation9_spill] sm:$0xff] }
  0x74   : > { %v633_v4 = vadd.f32 %v632_v45, %v524_v20  ;;  %v684_v20 = vsel %vm319_vm0, %v551_v62, 0.0  ;;  %v552_v23 = vmul.f32 %v2683_v43, %v2683_v43  ;;  %v692_v27 = vsel %vm319_vm0, %v555_v16, 0.0 }
  0x75   : > { %v685_v45 = vadd.f32 %v684_v20, %v550_v8  ;;  %v559_v32 = vmul.f32 %v2688_v48, %v2688_v48  ;;  %v557_v33 = vmul.f32 %v2691_v49, %v2691_v49  ;;  %v693_v40 = vadd.f32 %v692_v27, %v554_v24  ;;  %v4437_v8 = vld [vmem:[#allocation13_spill] sm:$0xff]  ;;  %v4438_v20 = vld [vmem:[#allocation14_spill] sm:$0xff] }
  0x76   : > { %614 = vadd.xlane.f32.xlu1 %v613_v53  ;;  %v644_v53 = vsel %vm319_vm0, %v531_v22, 0.0  ;;  %v680_v22 = vsel %vm319_vm0, %v549_v63, 0.0  ;;  %v558_v43 = vmul.f32 %v2696_v56, %v2696_v56  ;;  %v556_v48 = vmul.f32 %v2701_v59, %v2701_v59  ;;  %v4429_v59 = vld [vmem:[#allocation5_spill] sm:$0xff] }
  0x77   : > { %610 = vadd.xlane.f32.xlu0 %v609_v29  ;;  %v645_v29 = vadd.f32 %v644_v53, %v530_v26  ;;  %v688_v26 = vsel %vm319_vm0, %v553_v17, 0.0  ;;  %v700_v28 = vsel %vm319_vm0, %v559_v32, 0.0  ;;  %v563_v10 = vmul.f32 %v4426_v30, %v4426_v30  ;;  %v4439_v17 = vld [vmem:[#allocation15_spill] sm:$0xff] }
  0x78   : > { %v689_v53 = vadd.f32 %v688_v26, %v552_v23  ;;  %v696_v49 = vsel %vm319_vm0, %v557_v33, 0.0  ;;  %v701_v34 = vadd.f32 %v700_v28, %v558_v43  ;;  %v560_v6 = vmul.f32 %v4429_v59, %v4429_v59  ;;  %v4440_v23 = vld [vmem:[#allocation16_spill] sm:$0xff]  ;;  %v4441_v33 = vld [vmem:[#allocation17_spill] sm:$0xff] }
  0x79   : > { %v697_v36 = vadd.f32 %v696_v49, %v556_v48  ;;  %v566_v47 = vmul.f32 %v4432_v5, %v4432_v5  ;;  %v564_v52 = vmul.f32 %v4433_v0, %v4433_v0  ;;  %v570_v62 = vmul.f32 %v4436_v60, %v4436_v60  ;;  %v4443_v48 = vld [vmem:[#allocation19_spill] sm:$0xff]  ;;  %v4444_v49 = vld [vmem:[#allocation20_spill] sm:$0xff] }
  0x7a   : > { %622 = vadd.xlane.f32.xlu1 %v621_v37  ;;  %v660_v37 = vsel %vm319_vm0, %v539_v38, 0.0  ;;  %v708_v38 = vsel %vm319_vm0, %v563_v10, 0.0  ;;  %v577_v30 = vmul.f32 %v4443_v48, %v4443_v48  ;;  %v4452_v60 = vld [vmem:[#allocation28_spill] sm:$0xff]  ;;  %v4458_v48 = vld [vmem:[#allocation34_spill] sm:$0xff] }
  0x7b   : > { %618 = vadd.xlane.f32.xlu0 %v617_v7  ;;  %v661_v7 = vadd.f32 %v660_v37, %v538_v42  ;;  %v4431_v37 = vld [vmem:[#allocation7_spill] sm:$0xff] }
  0x7c   : > { %v565_v44 = vmul.f32 %v4431_v37, %v4431_v37 }
  0x7e   : > { %630 = vadd.xlane.f32.xlu1 %v629_v21  ;;  %v676_v21 = vsel %vm319_vm0, %v547_v54, 0.0  ;;  %v4434_v54 = vld [vmem:[#allocation10_spill] sm:$0xff] }
  0x7f   : > { %626 = vadd.xlane.f32.xlu0 %v625_v35  ;;  %v677_v35 = vadd.f32 %v676_v21, %v546_v58  ;;  %v571_v14 = vmul.f32 %v4434_v54, %v4434_v54  ;;  %v4435_v58 = vld [vmem:[#allocation11_spill] sm:$0xff] }
  0x82   : > { %638 = vadd.xlane.f32.xlu1 %v637_v11  ;;  %v681_v11 = vadd.f32 %v680_v22, %v548_v12  ;;  %v575_v12 = vmul.f32 %v4438_v20, %v4438_v20 }
  0x83   : > { %634 = vadd.xlane.f32.xlu0 %v633_v4  ;;  %v2452_v4 = vmov 0  }
  0x84   : > { %2251 = vset.pattern.permute.xlu1 %v2452_v4  ;;  %2250 = vset.pattern.permute.xlu0 %v2452_v4  ;;  %v732_v26 = vsel %vm319_vm0, %v575_v12, 0.0  ;;  %v572_v4 = vmul.f32 %v4441_v33, %v4441_v33  ;;  %v4454_v12 = vld [vmem:[#allocation30_spill] sm:$0xff] }
  0x86   : > { %646 = vadd.xlane.f32.xlu1 %v645_v29  ;;  %v561_v29 = vmul.f32 %v4427_v31, %v4427_v31  ;;  %v578_v31 = vmul.f32 %v4444_v49, %v4444_v49 }
  0x87   : > { %642 = vadd.xlane.f32.xlu0 %v641_v57  ;;  %v4428_v57 = vld [vmem:[#allocation4_spill] sm:$0xff] }
  0x88   : > { %v562_v56 = vmul.f32 %v4428_v57, %v4428_v57 }
  0x8a   : > { %654 = vadd.xlane.f32.xlu1 %v653_v25  ;;  %v567_v25 = vmul.f32 %v4430_v39, %v4430_v39  ;;  %v709_v46 = vadd.f32 %v708_v38, %v562_v56  ;;  %v4445_v56 = vld [vmem:[#allocation21_spill] sm:$0xff]  ;;  %v4446_v38 = vld [vmem:[#allocation22_spill] sm:$0xff]  ;;  %v736_v39 = vsel %vm319_vm0, %v577_v30, 0.0  ;;  %v595_v30 = vmul.f32 %v4458_v48, %v4458_v48 }
  0x8b   : > { %650 = vadd.xlane.f32.xlu0 %v649_v1  ;;  %v704_v1 = vsel %vm319_vm0, %v561_v29, 0.0  ;;  %v583_v59 = vmul.f32 %v4446_v38, %v4446_v38  ;;  %v606_v48 = vmul.f32 %v2912_v61, %v2912_v61 }
  0x8c   : > { %v705_v50 = vadd.f32 %v704_v1, %v560_v6 }
  0x8e   : > { %662 = vadd.xlane.f32.xlu1 %v661_v7 }
  0x8f   : > { %658 = vadd.xlane.f32.xlu0 %v657_v3  ;;  %v716_v3 = vsel %vm319_vm0, %v567_v25, 0.0  ;;  %v4447_v25 = vld [vmem:[#allocation23_spill] sm:$0xff] }
  0x90   : > { %v717_v21 = vadd.f32 %v716_v3, %v566_v47  ;;  %v581_v1 = vmul.f32 %v4447_v25, %v4447_v25  ;;  %v4449_v3 = vld [vmem:[#allocation25_spill] sm:$0xff] }
  0x91   : > { %v580_v0 = vmul.f32 %v4449_v3, %v4449_v3  ;;  %v4461_v25 = vld [vmem:[#allocation37_spill] sm:$0xff] }
  0x92   : > { %670 = vadd.xlane.f32.xlu1 %v669_v13  ;;  %v712_v13 = vsel %vm319_vm0, %v565_v44, 0.0  ;;  %v4448_v44 = vld [vmem:[#allocation24_spill] sm:$0xff] }
  0x93   : > { %666 = vadd.xlane.f32.xlu0 %v665_v15  ;;  %v569_v15 = vmul.f32 %v4435_v58, %v4435_v58  ;;  %v713_v63 = vadd.f32 %v712_v13, %v564_v52  ;;  %v4450_v52 = vld [vmem:[#allocation26_spill] sm:$0xff]  ;;  %v744_v13 = vsel %vm319_vm0, %v581_v1, 0.0  ;;  %v4451_v58 = vld [vmem:[#allocation27_spill] sm:$0xff]  ;;  %v592_v1 = vmul.f32 %v4461_v25, %v4461_v25 }
  0x94   : > { %v587_v54 = vmul.f32 %v4450_v52, %v4450_v52  ;;  %v598_v52 = vmul.f32 %v2876_v9, %v2876_v9 }
  0x95   : > { %v720_v22 = vsel %vm319_vm0, %v569_v15, 0.0  ;;  %v585_v15 = vmul.f32 %v4451_v58, %v4451_v58 }
  0x96   : > { %678 = vadd.xlane.f32.xlu1 %v677_v35  ;;  %v724_v35 = vsel %vm319_vm0, %v571_v14, 0.0 }
  0x97   : > { %674 = vadd.xlane.f32.xlu0 %v673_v51  ;;  %v568_v51 = vmul.f32 %v4437_v8, %v4437_v8  ;;  %v725_v24 = vadd.f32 %v724_v35, %v570_v62  ;;  %v586_v62 = vmul.f32 %v4452_v60, %v4452_v60  ;;  %v745_v35 = vadd.f32 %v744_v13, %v580_v0  ;;  %v4465_v60 = vld [vmem:[#allocation41_spill] sm:$0xff] }
  0x98   : > { %v756_v8 = vsel %vm319_vm0, %v587_v54, 0.0 }
  0x99   : > { %v721_v32 = vadd.f32 %v720_v22, %v568_v51  ;;  %v4453_v51 = vld [vmem:[#allocation29_spill] sm:$0xff]  ;;  %v591_v22 = vmul.f32 %v4454_v12, %v4454_v12  ;;  %v602_v12 = vmul.f32 %v2894_v41, %v2894_v41 }
  0x9a   : > { %686 = vadd.xlane.f32.xlu1 %v685_v45  ;;  %v573_v45 = vmul.f32 %v4439_v17, %v4439_v17  ;;  %v584_v20 = vmul.f32 %v4453_v51, %v4453_v51  ;;  %v4466_v51 = vld [vmem:[#allocation42_spill] sm:$0xff] }
  0x9b   : > { %682 = vadd.xlane.f32.xlu0 %v681_v11  ;;  %v574_v11 = vmul.f32 %v4440_v23, %v4440_v23 }
  0x9c   : > { %v728_v28 = vsel %vm319_vm0, %v573_v45, 0.0  ;;  %v752_v45 = vsel %vm319_vm0, %v585_v15, 0.0  ;;  %v4464_v15 = vld [vmem:[#allocation40_spill] sm:$0xff] }
  0x9d   : > { %v733_v10 = vadd.f32 %v732_v26, %v574_v11  ;;  %v757_v11 = vadd.f32 %v756_v8, %v586_v62  ;;  %v603_v62 = vmul.f32 %v4465_v60, %v4465_v60 }
  0x9e   : > { %694 = vadd.xlane.f32.xlu1 %v693_v40  ;;  %v4442_v40 = vld [vmem:[#allocation18_spill] sm:$0xff] }
  0x9f   : > { %690 = vadd.xlane.f32.xlu0 %v689_v53  ;;  %v3049_v2 = vpop.xlane.xlu1 %330  ;;  %v579_v43 = vmul.f32 %v4442_v40, %v4442_v40  ;;  %v764_v40 = vsel %vm319_vm0, %v591_v22, 0.0 }
  0xa0   : > { %v3056_v42 = vpop.xlane.xlu0 %322 }
  0xa1   : > { %v740_v57 = vsel %vm319_vm0, %v579_v43, 0.0  ;;  %v4457_v43 = vld [vmem:[#allocation33_spill] sm:$0xff] }
  0xa2   : > { %702 = vadd.xlane.f32.xlu1 %v701_v34  ;;  %v729_v34 = vadd.f32 %v728_v28, %v572_v4  ;;  %v741_v37 = vadd.f32 %v740_v57, %v578_v31  ;;  %v753_v4 = vadd.f32 %v752_v45, %v584_v20  ;;  %v588_v28 = vmul.f32 %v4457_v43, %v4457_v43  ;;  %v4459_v31 = vld [vmem:[#allocation35_spill] sm:$0xff]  ;;  %v4469_v43 = vld [vmem:[#allocation45_spill] sm:$0xff] }
  0xa3   : > { %698 = vadd.xlane.f32.xlu0 %v697_v36  ;;  %v3063_v7 = vpop.xlane.xlu1 %334  ;;  %v576_v36 = vmul.f32 %v4445_v56, %v4445_v56  ;;  %v4460_v56 = vld [vmem:[#allocation36_spill] sm:$0xff]  ;;  %v601_v20 = vmul.f32 %v4466_v51, %v4466_v51 }
  0xa4   : > { %v3070_v55 = vpop.xlane.xlu0 %326 }
  0xa5   : > { %v737_v47 = vadd.f32 %v736_v39, %v576_v36  ;;  %v594_v36 = vmul.f32 %v4460_v56, %v4460_v56  ;;  %v772_v39 = vsel %vm319_vm0, %v595_v30, 0.0 }
  0xa6   : > { %710 = vadd.xlane.f32.xlu1 %v709_v46  ;;  %v582_v46 = vmul.f32 %v4448_v44, %v4448_v44 }
  0xa7   : > { %706 = vadd.xlane.f32.xlu0 %v705_v50  ;;  %v3077_v18 = vpop.xlane.xlu1 %342  ;;  %v748_v50 = vsel %vm319_vm0, %v583_v59, 0.0  ;;  %v773_v0 = vadd.f32 %v772_v39, %v594_v36 }
  0xa8   : > { %v3084_v16 = vpop.xlane.xlu0 %338 }
  0xaa   : > { %718 = vadd.xlane.f32.xlu1 %v717_v21  ;;  %v749_v21 = vadd.f32 %v748_v50, %v582_v46  ;;  %v4463_v50 = vld [vmem:[#allocation39_spill] sm:$0xff] }
  0xab   : > { %714 = vadd.xlane.f32.xlu0 %v713_v63  ;;  %v3091_v27 = vpop.xlane.xlu1 %350  ;;  %v597_v3 = vmul.f32 %v4463_v50, %v4463_v50 }
  0xac   : > { %v3098_v53 = vpop.xlane.xlu0 %346 }
  0xad   : > { %v776_v8 = vsel %vm319_vm0, %v597_v3, 0.0 }
  0xae   : > { %726 = vadd.xlane.f32.xlu1 %v725_v24  ;;  %v4455_v24 = vld [vmem:[#allocation31_spill] sm:$0xff] }
  0xaf   : > { %722 = vadd.xlane.f32.xlu0 %v721_v32  ;;  %v3105_v29 = vpop.xlane.xlu1 %358  ;;  %v589_v23 = vmul.f32 %v4455_v24, %v4455_v24  ;;  %v4456_v32 = vld [vmem:[#allocation32_spill] sm:$0xff]  ;;  %v788_v24 = vsel %vm319_vm0, %v603_v62, 0.0 }
  0xb0   : > { %v3112_v6 = vpop.xlane.xlu0 %354  ;;  %v590_v26 = vmul.f32 %v4456_v32, %v4456_v32  ;;  %v4468_v32 = vld [vmem:[#allocation44_spill] sm:$0xff]  ;;  %v789_v41 = vadd.f32 %v788_v24, %v602_v12 }
  0xb1   : > { %v760_v49 = vsel %vm319_vm0, %v589_v23, 0.0  ;;  %v4467_v23 = vld [vmem:[#allocation43_spill] sm:$0xff] }
  0xb2   : > { %734 = vadd.xlane.f32.xlu1 %v733_v10  ;;  %v765_v57 = vadd.f32 %v764_v40, %v590_v26  ;;  %v761_v59 = vadd.f32 %v760_v49, %v588_v28  ;;  %v607_v26 = vmul.f32 %v4468_v32, %v4468_v32  ;;  %v784_v40 = vsel %vm319_vm0, %v601_v20, 0.0 }
  0xb3   : > { %730 = vadd.xlane.f32.xlu0 %v729_v34  ;;  %v3119_v5 = vpop.xlane.xlu1 %366  ;;  %v593_v34 = vmul.f32 %v4459_v31, %v4459_v31  ;;  %v605_v28 = vmul.f32 %v4469_v43, %v4469_v43  ;;  %v3266_v32 = vmul.f32 0.0051020407, %v3063_v7 }
  0xb4   : > { %v3126_v14 = vpop.xlane.xlu0 %362  ;;  %v796_v31 = vsel %vm319_vm0, %v607_v26, 0.0 }
  0xb5   : > { %v792_v56 = vsel %vm319_vm0, %v605_v28, 0.0  ;;  %v797_v36 = vadd.f32 %v796_v31, %v606_v48  ;;  %4471 = vst [vmem:[#allocation3_spill] sm:$0xff] %v3266_v32  ;;  %v3271_v28 = vmul.f32 0.0051020407, %v3049_v2  ;;  %v899_v7 = vmul.f32 %v3266_v32, %v3266_v32 }
  0xb6   : > { %742 = vadd.xlane.f32.xlu1 %v741_v37  ;;  %v4462_v37 = vld [vmem:[#allocation38_spill] sm:$0xff] }
  0xb7   : > { %738 = vadd.xlane.f32.xlu0 %v737_v47  ;;  %v3133_v63 = vpop.xlane.xlu1 %374  ;;  %v599_v44 = vmul.f32 %v4462_v37, %v4462_v37  ;;  %v768_v47 = vsel %vm319_vm0, %v593_v34, 0.0  ;;  %v604_v34 = vmul.f32 %v2919_v19, %v2919_v19  ;;  %4472 = vst [vmem:[#allocation4_spill] sm:$0xff] %v3271_v28  ;;  %v898_v2 = vmul.f32 %v3271_v28, %v3271_v28 }
  0xb8   : > { %v3140_v17 = vpop.xlane.xlu0 %370  ;;  %v769_v13 = vadd.f32 %v768_v47, %v592_v1 }
  0xb9   : > { %v780_v58 = vsel %vm319_vm0, %v599_v44, 0.0  ;;  %v793_v39 = vadd.f32 %v792_v56, %v604_v34 }
  0xba   : > { %750 = vadd.xlane.f32.xlu1 %v749_v21  ;;  %v596_v21 = vmul.f32 %v4464_v15, %v4464_v15  ;;  %v781_v9 = vadd.f32 %v780_v58, %v598_v52 }
  0xbb   : > { %746 = vadd.xlane.f32.xlu0 %v745_v35  ;;  %v3147_v33 = vpop.xlane.xlu1 %382 }
  0xbc   : > { %v3154_v10 = vpop.xlane.xlu0 %378  ;;  %v777_v45 = vadd.f32 %v776_v8, %v596_v21 }
  0xbe   : > { %758 = vadd.xlane.f32.xlu1 %v757_v11  ;;  %v600_v11 = vmul.f32 %v4467_v23, %v4467_v23  ;;  %v3263_v23 = vmul.f32 0.0051020407, %v3056_v42  ;;  %v3276_v42 = vmul.f32 0.0051020407, %v3077_v18 }
  0xbf   : > { %754 = vadd.xlane.f32.xlu0 %v753_v4  ;;  %v3161_v38 = vpop.xlane.xlu1 %390 }
  0xc0   : > { %v3168_v46 = vpop.xlane.xlu0 %386  ;;  %v785_v49 = vadd.f32 %v784_v40, %v600_v11  ;;  %4470 = vst [vmem:[#allocation2_spill] sm:$0xff] %v3263_v23  ;;  %v901_v18 = vmul.f32 %v3276_v42, %v3276_v42 }
  0xc2   : > { %766 = vadd.xlane.f32.xlu1 %v765_v57 }
  0xc3   : > { %762 = vadd.xlane.f32.xlu0 %v761_v59  ;;  %v3175_v54 = vpop.xlane.xlu1 %398 }
  0xc4   : > { %v3182_v35 = vpop.xlane.xlu0 %394 }
  0xc6   : > { %774 = vadd.xlane.f32.xlu1 %v773_v0 }
  0xc7   : > { %770 = vadd.xlane.f32.xlu0 %v769_v13  ;;  %v3189_v22 = vpop.xlane.xlu1 %406 }
  0xc8   : > { %v3196_v4 = vpop.xlane.xlu0 %402 }
  0xca   : > { %782 = vadd.xlane.f32.xlu1 %v781_v9 }
  0xcb   : > { %778 = vadd.xlane.f32.xlu0 %v777_v45  ;;  %v3203_v30 = vpop.xlane.xlu1 %414  ;;  %v3258_v45 = vmul.f32 0.0051020407, %v3070_v55  ;;  %v896_v55 = vmul.f32 %v3263_v23, %v3263_v23 }
  0xcc   : > { %v3208_v57 = vpop.xlane.xlu0 %410 }
  0xcd   : > { %v897_v26 = vmul.f32 %v3258_v45, %v3258_v45 }
  0xce   : > { %790 = vadd.xlane.f32.xlu1 %v789_v41 }
  0xcf   : > { %786 = vadd.xlane.f32.xlu0 %v785_v49  ;;  %v3211_v59 = vpop.xlane.xlu1 %422 }
  0xd0   : > { %v3213_v61 = vpop.xlane.xlu0 %418 }
  0xd2   : > { %798 = vadd.xlane.f32.xlu1 %v797_v36 }
  0xd3   : > { %794 = vadd.xlane.f32.xlu0 %v793_v39  ;;  %v3215_v25 = vpop.xlane.xlu1 %430  ;;  %v3283_v39 = vmul.f32 0.0051020407, %v3084_v16 }
  0xd4   : > { %v3217_v1 = vpop.xlane.xlu0 %426 }
  0xd5   : > { %4473 = vst [vmem:[#allocation5_spill] sm:$0xff] %v3283_v39  ;;  %v900_v16 = vmul.f32 %v3283_v39, %v3283_v39 }
  0xd7   : > { %v3219_v37 = vpop.xlane.xlu1 %438 }
  0xd8   : > { %v3221_v19 = vpop.xlane.xlu0 %434 }
  0xdb   : > { %v3223_v44 = vpop.xlane.xlu1 %446 }
  0xdc   : > { %v3225_v47 = vpop.xlane.xlu0 %442 }
  0xdf   : > { %v3227_v50 = vpop.xlane.xlu1 %454 }
  0xe0   : > { %v3229_v3 = vpop.xlane.xlu0 %450 }
  0xe3   : > { %v3231_v0 = vpop.xlane.xlu1 %462 }
  0xe4   : > { %v3233_v52 = vpop.xlane.xlu0 %458 }
  0xe7   : > { %v3235_v13 = vpop.xlane.xlu1 %470 }
  0xe8   : > { %v3237_v58 = vpop.xlane.xlu0 %466 }
  0xeb   : > { %v3239_v15 = vpop.xlane.xlu1 %478 }
  0xec   : > { %v3241_v21 = vpop.xlane.xlu0 %474 }
  0xef   : > { %v3243_v60 = vpop.xlane.xlu1 %486 }
  0xf0   : > { %v3245_v62 = vpop.xlane.xlu0 %482 }
  0xf3   : > { %v3247_v8 = vpop.xlane.xlu1 %494 }
  0xf4   : > { %v3249_v51 = vpop.xlane.xlu0 %490 }
  0xf7   : > { %v3251_v20 = vpop.xlane.xlu1 %502 }
  0xf8   : > { %v3253_v9 = vpop.xlane.xlu0 %498 }
  0xfb   : > { %v3255_v12 = vpop.xlane.xlu1 %510 }
  0xfc   : > { %v3260_v24 = vpop.xlane.xlu0 %506 }
  0xff   : > { %v615_v11 = vpop.xlane.xlu1 %614 }
 0x100   : > { %v849_v40 = vmul.f32 0.0051020407, %v615_v11  ;;  %v611_v43 = vpop.xlane.xlu0 %610 }
 0x101   : > { %v848_v41 = vmul.f32 0.0051020407, %v611_v43 }
 0x102   : > { %v945_v48 = vsub.f32 %v849_v40, %v897_v26 }
 0x103   : > { %v944_v49 = vsub.f32 %v848_v41, %v896_v55  ;;  %v623_v31 = vpop.xlane.xlu1 %622 }
 0x104   : > { %v993_v34 = vmax.f32 %v945_v48, 0.0  ;;  %v851_v56 = vmul.f32 0.0051020407, %v623_v31  ;;  %v619_v36 = vpop.xlane.xlu0 %618  ;;  %v3288_v48 = vmul.f32 0.0051020407, %v3098_v53 }
 0x105   : > { %v992_v11 = vmax.f32 %v944_v49, 0.0  ;;  %v850_v43 = vmul.f32 0.0051020407, %v619_v36 }
 0x106   : > { %v1041_v26 = vadd.f32 1e-05, %v993_v34  ;;  %v947_v40 = vsub.f32 %v851_v56, %v899_v7  ;;  %4474 = vst [vmem:[#allocation6_spill] sm:$0xff] %v3288_v48  ;;  %v3293_v34 = vmul.f32 0.0051020407, %v3091_v27 }
 0x107   : > { %v1040_v55 = vadd.f32 1e-05, %v992_v11  ;;  %v946_v41 = vsub.f32 %v850_v43, %v898_v2  ;;  %v631_v23 = vpop.xlane.xlu1 %630  ;;  %v902_v43 = vmul.f32 %v3288_v48, %v3288_v48 }
 0x108   : > { %2252 = vrsqrt.f32 %v1041_v26  ;;  %v995_v31 = vmax.f32 %v947_v40, 0.0  ;;  %v853_v32 = vmul.f32 0.0051020407, %v631_v23  ;;  %v627_v28 = vpop.xlane.xlu0 %626  ;;  %4475 = vst [vmem:[#allocation7_spill] sm:$0xff] %v3293_v34  ;;  %v3298_v23 = vmul.f32 0.0051020407, %v3105_v29 }
 0x109   : > { %2254 = vrsqrt.f32 %v1040_v55  ;;  %v994_v49 = vmax.f32 %v946_v41, 0.0  ;;  %v852_v7 = vmul.f32 0.0051020407, %v627_v28  ;;  %v903_v27 = vmul.f32 %v3293_v34, %v3293_v34 }
 0x10a   : > { %v1043_v56 = vadd.f32 1e-05, %v995_v31  ;;  %v949_v2 = vsub.f32 %v853_v32, %v901_v18  ;;  %4476 = vst [vmem:[#allocation8_spill] sm:$0xff] %v3298_v23  ;;  %v3304_v32 = vmul.f32 0.0051020407, %v3112_v6  ;;  %v905_v29 = vmul.f32 %v3298_v23, %v3298_v23 }
 0x10b   : > { %v1042_v36 = vadd.f32 1e-05, %v994_v49  ;;  %v948_v11 = vsub.f32 %v852_v7, %v900_v16  ;;  %v639_v53 = vpop.xlane.xlu1 %638  ;;  %v3309_v49 = vmul.f32 0.0051020407, %v3119_v5  ;;  %v3319_v6 = vmul.f32 0.0051020407, %v3126_v14 }
 0x10c   : > { %v635_v26 = vpop.xlane.xlu0 %634  ;;  %v855_v55 = vmul.f32 0.0051020407, %v639_v53  ;;  %4477 = vst [vmem:[#allocation9_spill] sm:$0xff] %v3304_v32  ;;  %v997_v18 = vmax.f32 %v949_v2, 0.0  ;;  %v3324_v53 = vmul.f32 0.0051020407, %v3133_v63 }
 0x10d   : > { %2256 = vrsqrt.f32 %v1042_v36  ;;  %v996_v40 = vmax.f32 %v948_v11, 0.0  ;;  %v854_v28 = vmul.f32 0.0051020407, %v635_v26  ;;  %4478 = vst [vmem:[#allocation10_spill] sm:$0xff] %v3309_v49  ;;  %4479 = vst [vmem:[#allocation11_spill] sm:$0xff] %v3319_v6  ;;  %v904_v11 = vmul.f32 %v3304_v32, %v3304_v32 }
 0x10e   : > { %2258 = vrsqrt.f32 %v1043_v56  ;;  %v951_v56 = vsub.f32 %v855_v55, %v903_v27  ;;  %v1136_v55 = vld [vmem:[%s3316_s22] sm:$0xff] }
 0x10f   : > { %v1044_v41 = vadd.f32 1e-05, %v996_v40  ;;  %v950_v31 = vsub.f32 %v854_v28, %v902_v43  ;;  %v647_v16 = vpop.xlane.xlu1 %646  ;;  %v1045_v43 = vadd.f32 1e-05, %v997_v18  ;;  %v1137_v28 = vld [vmem:[%s3316_s22 + $0x8] sm:$0xff] }
 0x110   : > { %v857_v7 = vmul.f32 0.0051020407, %v647_v16  ;;  %v643_v36 = vpop.xlane.xlu0 %642  ;;  %v907_v16 = vmul.f32 %v3309_v49, %v3309_v49  ;;  %v3333_v18 = vmul.f32 0.0051020407, %v3140_v17 }
 0x111   : > { %v856_v2 = vmul.f32 0.0051020407, %v643_v36  ;;  %2260 = vrsqrt.f32 %v1044_v41  ;;  %v998_v26 = vmax.f32 %v950_v31, 0.0  ;;  %v906_v36 = vmul.f32 %v3319_v6, %v3319_v6 }
 0x112   : > { %v953_v5 = vsub.f32 %v857_v7, %v905_v29  ;;  %v999_v29 = vmax.f32 %v951_v56, 0.0  ;;  %4480 = vst [vmem:[#allocation12_spill] sm:$0xff] %v3333_v18  ;;  %2262 = vrsqrt.f32 %v1045_v43  ;;  %v3342_v56 = vmul.f32 0.0051020407, %v3147_v33 }
 0x113   : > { %v655_v40 = vpop.xlane.xlu1 %654  ;;  %v952_v7 = vsub.f32 %v856_v2, %v904_v11 }
 0x114   : > { %v1001_v48 = vmax.f32 %v953_v5, 0.0  ;;  %v859_v14 = vmul.f32 0.0051020407, %v655_v40  ;;  %v651_v39 = vpop.xlane.xlu0 %650  ;;  %v909_v5 = vmul.f32 %v3324_v53, %v3324_v53  ;;  %v1046_v40 = vadd.f32 1e-05, %v998_v26  ;;  %4481 = vst [vmem:[#allocation13_spill] sm:$0xff] %v3342_v56 }
 0x115   : > { %v2253_v27 = vpop.eup %2252  ;;  %v858_v63 = vmul.f32 0.0051020407, %v651_v39  ;;  %v1047_v11 = vadd.f32 1e-05, %v999_v29 }
 0x116   : > { %v2255_v32 = vpop.eup %2254  ;;  %v1049_v41 = vadd.f32 1e-05, %v1001_v48  ;;  %v955_v31 = vsub.f32 %v859_v14, %v907_v16  ;;  %v3335_v23 = vmul.f32 %v2253_v27, %v1137_v28  ;;  %v1138_v48 = vld [vmem:[%s3316_s22 + $0x10] sm:$0xff]  ;;  %v1000_v28 = vmax.f32 %v952_v7, 0.0 }
 0x117   : > { %v663_v49 = vpop.xlane.xlu1 %662  ;;  %v3339_v34 = vmul.f32 %v2255_v32, %v1136_v55  ;;  %v954_v16 = vsub.f32 %v858_v63, %v906_v36  ;;  %v3348_v32 = vmul.f32 0.0051020407, %v3154_v10  ;;  %v3353_v55 = vmul.f32 0.0051020407, %v3161_v38 }
 0x118   : > { %2264 = vrsqrt.f32 %v1049_v41  ;;  %v1003_v39 = vmax.f32 %v955_v31, 0.0  ;;  %v861_v2 = vmul.f32 0.0051020407, %v663_v49  ;;  %v659_v17 = vpop.xlane.xlu0 %658  ;;  %1383 = vperm.xlu1 %2251, %v3335_v23   ;;  %v908_v49 = vmul.f32 %v3333_v18, %v3333_v18  ;;  %v1139_v31 = vld [vmem:[%s3316_s22 + $0x18] sm:$0xff] }
 0x119   : > { %v860_v14 = vmul.f32 0.0051020407, %v659_v17  ;;  %1378 = vperm.xlu0 %2250, %v3339_v34   ;;  %4482 = vst [vmem:[#allocation14_spill] sm:$0xff] %v3348_v32  ;;  %4483 = vst [vmem:[#allocation15_spill] sm:$0xff] %v3353_v55  ;;  %2266 = vrsqrt.f32 %v1046_v40  ;;  %v911_v7 = vmul.f32 %v3342_v56, %v3342_v56  ;;  %v910_v38 = vmul.f32 %v3348_v32, %v3348_v32 }
 0x11a   : > { %v2257_v43 = vpop.eup %2256  ;;  %v1051_v33 = vadd.f32 1e-05, %v1003_v39  ;;  %v957_v26 = vsub.f32 %v861_v2, %v909_v5  ;;  %v1048_v5 = vadd.f32 1e-05, %v1000_v28  ;;  %v1002_v39 = vmax.f32 %v954_v16, 0.0 }
 0x11b   : > { %v671_v27 = vpop.xlane.xlu1 %670  ;;  %v3355_v29 = vmul.f32 %v2257_v43, %v1138_v48  ;;  %v2259_v36 = vpop.eup %2258  ;;  %v956_v2 = vsub.f32 %v860_v14, %v908_v49  ;;  %v913_v48 = vmul.f32 %v3353_v55, %v3353_v55  ;;  %v3366_v43 = vmul.f32 0.0051020407, %v3168_v46 }
 0x11c   : > { %2268 = vrsqrt.f32 %v1051_v33  ;;  %v1005_v63 = vmax.f32 %v957_v26, 0.0  ;;  %v863_v10 = vmul.f32 0.0051020407, %v671_v27  ;;  %v667_v41 = vpop.xlane.xlu0 %666  ;;  %v3371_v16 = vmul.f32 0.0051020407, %v3175_v54 }
 0x11d   : > { %2270 = vrsqrt.f32 %v1047_v11  ;;  %1388 = vperm.xlu1 %2251, %v3355_v29   ;;  %4484 = vst [vmem:[#allocation16_spill] sm:$0xff] %v3366_v43  ;;  %v862_v33 = vmul.f32 0.0051020407, %v667_v41  ;;  %v3368_v11 = vmul.f32 %v2259_v36, %v1139_v31  ;;  %v1050_v46 = vadd.f32 1e-05, %v1002_v39 }
 0x11e   : > { %v1053_v40 = vadd.f32 1e-05, %v1005_v63  ;;  %v959_v17 = vsub.f32 %v863_v10, %v911_v7  ;;  %v2261_v28 = vpop.eup %2260  ;;  %4485 = vst [vmem:[#allocation17_spill] sm:$0xff] %v3371_v16  ;;  %v1140_v7 = vld [vmem:[%s3316_s22 + $0x20] sm:$0xff]  ;;  %v3375_v63 = vmul.f32 0.0051020407, %v3182_v35  ;;  %v912_v54 = vmul.f32 %v3366_v43, %v3366_v43 }
 0x11f   : > { %v679_v26 = vpop.xlane.xlu1 %678  ;;  %v1004_v10 = vmax.f32 %v956_v2, 0.0  ;;  %v3383_v32 = vmul.f32 %v2261_v28, %v1140_v7  ;;  %v1145_v35 = vld [vmem:[%s3316_s22 + $0x48] sm:$0xff]  ;;  %v915_v39 = vmul.f32 %v3371_v16, %v3371_v16 }
 0x120   : > { %2272 = vrsqrt.f32 %v1053_v40  ;;  %v1007_v14 = vmax.f32 %v959_v17, 0.0  ;;  %v865_v49 = vmul.f32 0.0051020407, %v679_v26  ;;  %v675_v27 = vpop.xlane.xlu0 %674  ;;  %4486 = vst [vmem:[#allocation18_spill] sm:$0xff] %v3375_v63  ;;  %v3381_v40 = vmul.f32 0.0051020407, %v3189_v22 }
 0x121   : > { %2274 = vrsqrt.f32 %v1048_v5  ;;  %1393 = vperm.xlu1 %2251, %v3368_v11   ;;  %v864_v31 = vmul.f32 0.0051020407, %v675_v27  ;;  %v958_v17 = vsub.f32 %v862_v33, %v910_v38  ;;  %v2263_v5 = vpop.eup %2262  ;;  %v914_v22 = vmul.f32 %v3375_v63, %v3375_v63 }
 0x122   : > { %v1055_v36 = vadd.f32 1e-05, %v1007_v14  ;;  %v961_v41 = vsub.f32 %v865_v49, %v913_v48  ;;  %4487 = vst [vmem:[#allocation19_spill] sm:$0xff] %v3381_v40  ;;  %v1141_v49 = vld [vmem:[%s3316_s22 + $0x28] sm:$0xff]  ;;  %v3392_v38 = vmul.f32 0.0051020407, %v3196_v4 }
 0x123   : > { %v687_v26 = vpop.xlane.xlu1 %686  ;;  %v1052_v33 = vadd.f32 1e-05, %v1004_v10  ;;  %v960_v7 = vsub.f32 %v864_v31, %v912_v54  ;;  %v1006_v43 = vmax.f32 %v958_v17, 0.0  ;;  %v3399_v63 = vmul.f32 %v2263_v5, %v1141_v49  ;;  %v1147_v4 = vld [vmem:[%s3316_s22 + $0x58] sm:$0xff] }
 0x124   : > { %2276 = vrsqrt.f32 %v1055_v36  ;;  %v1009_v2 = vmax.f32 %v961_v41, 0.0  ;;  %v867_v14 = vmul.f32 0.0051020407, %v687_v26  ;;  %v683_v48 = vpop.xlane.xlu0 %682  ;;  %4488 = vst [vmem:[#allocation20_spill] sm:$0xff] %v3392_v38  ;;  %v917_v26 = vmul.f32 %v3381_v40, %v3381_v40 }
 0x125   : > { %v2265_v27 = vpop.eup %2264  ;;  %2278 = vrsqrt.f32 %v1050_v46  ;;  %1398 = vperm.xlu1 %2251, %v3383_v32   ;;  %v866_v18 = vmul.f32 0.0051020407, %v683_v48  ;;  %v3403_v46 = vmul.f32 0.0051020407, %v3203_v30  ;;  %v916_v17 = vmul.f32 %v3392_v38, %v3392_v38 }
 0x126   : > { %v1057_v28 = vadd.f32 1e-05, %v1009_v2  ;;  %v963_v36 = vsub.f32 %v867_v14, %v915_v39  ;;  %v3395_v41 = vmul.f32 %v2265_v27, %v1145_v35  ;;  %v2267_v6 = vpop.eup %2266  ;;  %v1142_v35 = vld [vmem:[%s3316_s22 + $0x30] sm:$0xff]  ;;  %v3410_v5 = vmul.f32 0.0051020407, %v3208_v57  ;;  %v1143_v27 = vld [vmem:[%s3316_s22 + $0x38] sm:$0xff] }
 0x127   : > { %v695_v16 = vpop.xlane.xlu1 %694  ;;  %4489 = vst [vmem:[#allocation21_spill] sm:$0xff] %v3403_v46  ;;  %v3413_v2 = vmul.f32 0.0051020407, %v3211_v59  ;;  %v3419_v55 = vmul.f32 %v2267_v6, %v1142_v35  ;;  %v1149_v57 = vld [vmem:[%s3316_s22 + $0x68] sm:$0xff]  ;;  %v919_v59 = vmul.f32 %v3403_v46, %v3403_v46  ;;  %v1144_v35 = vld [vmem:[%s3316_s22 + $0x40] sm:$0xff] }
 0x128   : > { %2280 = vrsqrt.f32 %v1057_v28  ;;  %v1011_v10 = vmax.f32 %v963_v36, 0.0  ;;  %v869_v31 = vmul.f32 0.0051020407, %v695_v16  ;;  %v691_v54 = vpop.xlane.xlu0 %690  ;;  %1423 = vperm.xlu0 %2250, %v3395_v41   ;;  %4490 = vst [vmem:[#allocation22_spill] sm:$0xff] %v3410_v5  ;;  %v1008_v16 = vmax.f32 %v960_v7, 0.0 }
 0x129   : > { %v2269_v39 = vpop.eup %2268  ;;  %4491 = vst [vmem:[#allocation23_spill] sm:$0xff] %v3413_v2  ;;  %2282 = vrsqrt.f32 %v1052_v33  ;;  %1403 = vperm.xlu1 %2251, %v3399_v63   ;;  %v1054_v28 = vadd.f32 1e-05, %v1006_v43  ;;  %v962_v36 = vsub.f32 %v866_v18, %v914_v22  ;;  %v868_v38 = vmul.f32 0.0051020407, %v691_v54 }
 0x12a   : > { %v2271_v30 = vpop.eup %2270  ;;  %v1059_v14 = vadd.f32 1e-05, %v1011_v10  ;;  %v965_v48 = vsub.f32 %v869_v31, %v917_v26  ;;  %v3416_v49 = vmul.f32 %v2269_v39, %v1147_v4  ;;  %v918_v43 = vmul.f32 %v3410_v5, %v3410_v5 }
 0x12b   : > { %v703_v40 = vpop.xlane.xlu1 %702  ;;  %v921_v6 = vmul.f32 %v3413_v2, %v3413_v2  ;;  %v3430_v18 = vmul.f32 0.0051020407, %v3213_v61  ;;  %v3433_v22 = vmul.f32 %v2271_v30, %v1143_v27  ;;  %v1010_v39 = vmax.f32 %v962_v36, 0.0  ;;  %v1151_v2 = vld [vmem:[%s3316_s22 + $0x78] sm:$0xff] }
 0x12c   : > { %2284 = vrsqrt.f32 %v1059_v14  ;;  %v1013_v33 = vmax.f32 %v965_v48, 0.0  ;;  %v871_v56 = vmul.f32 0.0051020407, %v703_v40  ;;  %v699_v7 = vpop.xlane.xlu0 %698  ;;  %1433 = vperm.xlu0 %2250, %v3416_v49   ;;  %v1056_v40 = vadd.f32 1e-05, %v1008_v16 }
 0x12d   : > { %v2273_v26 = vpop.eup %2272  ;;  %4492 = vst [vmem:[#allocation24_spill] sm:$0xff] %v3430_v18  ;;  %1408 = vperm.xlu1 %2251, %v3419_v55   ;;  %2286 = vrsqrt.f32 %v1054_v28  ;;  %v964_v14 = vsub.f32 %v868_v38, %v916_v17  ;;  %v870_v48 = vmul.f32 0.0051020407, %v699_v7  ;;  %v3440_v61 = vmul.f32 0.0051020407, %v3215_v25 }
 0x12e   : > { %v2275_v4 = vpop.eup %2274  ;;  %v1061_v10 = vadd.f32 1e-05, %v1013_v33  ;;  %v967_v31 = vsub.f32 %v871_v56, %v919_v59  ;;  %v3435_v54 = vmul.f32 %v2273_v26, %v1149_v57  ;;  %v920_v16 = vmul.f32 %v3430_v18, %v3430_v18  ;;  %v1146_v59 = vld [vmem:[%s3316_s22 + $0x50] sm:$0xff] }
 0x12f   : > { %v711_v5 = vpop.xlane.xlu1 %710  ;;  %4493 = vst [vmem:[#allocation25_spill] sm:$0xff] %v3440_v61  ;;  %v3446_v38 = vmul.f32 0.0051020407, %v3217_v1  ;;  %v3449_v17 = vmul.f32 0.0051020407, %v3219_v37  ;;  %v3452_v25 = vmul.f32 %v2275_v4, %v1144_v35  ;;  %v1012_v7 = vmax.f32 %v964_v14, 0.0 }
 0x130   : > { %2288 = vrsqrt.f32 %v1061_v10  ;;  %v1015_v30 = vmax.f32 %v967_v31, 0.0  ;;  %v873_v27 = vmul.f32 0.0051020407, %v711_v5  ;;  %v707_v46 = vpop.xlane.xlu0 %706  ;;  %1443 = vperm.xlu0 %2250, %v3435_v54   ;;  %v1058_v33 = vadd.f32 1e-05, %v1010_v39  ;;  %v1153_v31 = vld [vmem:[%s3316_s22 + $0x88] sm:$0xff] }
 0x131   : > { %v2277_v56 = vpop.eup %2276  ;;  %4494 = vst [vmem:[#allocation26_spill] sm:$0xff] %v3446_v38  ;;  %4495 = vst [vmem:[#allocation27_spill] sm:$0xff] %v3449_v17  ;;  %1413 = vperm.xlu1 %2251, %v3433_v22   ;;  %2290 = vrsqrt.f32 %v1056_v40  ;;  %v966_v26 = vsub.f32 %v870_v48, %v918_v43  ;;  %v872_v10 = vmul.f32 0.0051020407, %v707_v46  ;;  %v923_v37 = vmul.f32 %v3440_v61, %v3440_v61 }
 0x132   : > { %v2279_v28 = vpop.eup %2278  ;;  %v1063_v5 = vadd.f32 1e-05, %v1015_v30  ;;  %v969_v36 = vsub.f32 %v873_v27, %v921_v6  ;;  %v3454_v57 = vmul.f32 %v2277_v56, %v1151_v2  ;;  %v922_v2 = vmul.f32 %v3446_v38, %v3446_v38  ;;  %v1155_v38 = vld [vmem:[%s3316_s22 + $0x98] sm:$0xff] }
 0x133   : > { %v719_v1 = vpop.xlane.xlu1 %718  ;;  %v925_v43 = vmul.f32 %v3449_v17, %v3449_v17  ;;  %v3466_v46 = vmul.f32 0.0051020407, %v3221_v19  ;;  %v3471_v27 = vmul.f32 %v2279_v28, %v1146_v59  ;;  %v1060_v56 = vadd.f32 1e-05, %v1012_v7 }
 0x134   : > { %2292 = vrsqrt.f32 %v1063_v5  ;;  %v1017_v18 = vmax.f32 %v969_v36, 0.0  ;;  %v875_v4 = vmul.f32 0.0051020407, %v719_v1  ;;  %v715_v35 = vpop.xlane.xlu0 %714  ;;  %1453 = vperm.xlu0 %2250, %v3454_v57   ;;  %v1014_v5 = vmax.f32 %v966_v26, 0.0 }
 0x135   : > { %v2281_v40 = vpop.eup %2280  ;;  %4496 = vst [vmem:[#allocation28_spill] sm:$0xff] %v3466_v46  ;;  %v874_v6 = vmul.f32 0.0051020407, %v715_v35  ;;  %1418 = vperm.xlu1 %2251, %v3452_v25   ;;  %2294 = vrsqrt.f32 %v1058_v33  ;;  %v968_v36 = vsub.f32 %v872_v10, %v920_v16  ;;  %v3475_v19 = vmul.f32 0.0051020407, %v3223_v44 }
 0x136   : > { %v2283_v39 = vpop.eup %2282  ;;  %v1065_v14 = vadd.f32 1e-05, %v1017_v18  ;;  %v971_v48 = vsub.f32 %v875_v4, %v923_v37  ;;  %v3469_v30 = vmul.f32 %v2281_v40, %v1153_v31  ;;  %v1148_v18 = vld [vmem:[%s3316_s22 + $0x60] sm:$0xff]  ;;  %v924_v28 = vmul.f32 %v3466_v46, %v3466_v46 }
 0x137   : > { %v727_v1 = vpop.xlane.xlu1 %726  ;;  %4497 = vst [vmem:[#allocation29_spill] sm:$0xff] %v3475_v19  ;;  %v3482_v59 = vmul.f32 0.0051020407, %v3225_v47  ;;  %v970_v16 = vsub.f32 %v874_v6, %v922_v2  ;;  %v3486_v44 = vmul.f32 0.0051020407, %v3227_v50  ;;  %v1016_v4 = vmax.f32 %v968_v36, 0.0 }
 0x138   : > { %2296 = vrsqrt.f32 %v1065_v14  ;;  %v1019_v35 = vmax.f32 %v971_v48, 0.0  ;;  %v877_v17 = vmul.f32 0.0051020407, %v727_v1  ;;  %v723_v61 = vpop.xlane.xlu0 %722  ;;  %1463 = vperm.xlu0 %2250, %v3469_v30   ;;  %v1062_v37 = vadd.f32 1e-05, %v1014_v5  ;;  %v1157_v47 = vld [vmem:[%s3316_s22 + $0xa8] sm:$0xff] }
 0x139   : > { %v2285_v31 = vpop.eup %2284  ;;  %4498 = vst [vmem:[#allocation30_spill] sm:$0xff] %v3482_v59  ;;  %v876_v33 = vmul.f32 0.0051020407, %v723_v61  ;;  %1428 = vperm.xlu1 %2251, %v3471_v27   ;;  %4499 = vst [vmem:[#allocation31_spill] sm:$0xff] %v3486_v44  ;;  %2298 = vrsqrt.f32 %v1060_v56  ;;  %v3490_v14 = vmul.f32 %v2283_v39, %v1148_v18  ;;  %v927_v61 = vmul.f32 %v3475_v19, %v3475_v19 }
 0x13a   : > { %v1067_v7 = vadd.f32 1e-05, %v1019_v35  ;;  %v973_v26 = vsub.f32 %v877_v17, %v925_v43  ;;  %v3488_v10 = vmul.f32 %v2285_v31, %v1155_v38  ;;  %v2287_v48 = vpop.eup %2286  ;;  %v1150_v17 = vld [vmem:[%s3316_s22 + $0x70] sm:$0xff]  ;;  %v926_v43 = vmul.f32 %v3482_v59, %v3482_v59 }
 0x13b   : > { %v735_v40 = vpop.xlane.xlu1 %734  ;;  %v1018_v56 = vmax.f32 %v970_v16, 0.0  ;;  %v972_v39 = vsub.f32 %v876_v33, %v924_v28  ;;  %v3501_v36 = vmul.f32 0.0051020407, %v3229_v3  ;;  %v3507_v16 = vmul.f32 %v2287_v48, %v1150_v17  ;;  %v1159_v28 = vld [vmem:[%s3316_s22 + $0xb8] sm:$0xff] }
 0x13c   : > { %2300 = vrsqrt.f32 %v1067_v7  ;;  %v1021_v2 = vmax.f32 %v973_v26, 0.0  ;;  %v879_v50 = vmul.f32 0.0051020407, %v735_v40  ;;  %v731_v6 = vpop.xlane.xlu0 %730  ;;  %1473 = vperm.xlu0 %2250, %v3488_v10   ;;  %v929_v7 = vmul.f32 %v3486_v44, %v3486_v44 }
 0x13d   : > { %v2289_v38 = vpop.eup %2288  ;;  %v878_v5 = vmul.f32 0.0051020407, %v731_v6  ;;  %1438 = vperm.xlu1 %2251, %v3490_v14   ;;  %4500 = vst [vmem:[#allocation32_spill] sm:$0xff] %v3501_v36  ;;  %2302 = vrsqrt.f32 %v1062_v37  ;;  %v1064_v26 = vadd.f32 1e-05, %v1016_v4 }
 0x13e   : > { %v1069_v1 = vadd.f32 1e-05, %v1021_v2  ;;  %v975_v35 = vsub.f32 %v879_v50, %v927_v61  ;;  %v3503_v18 = vmul.f32 %v2289_v38, %v1157_v47  ;;  %v2291_v31 = vpop.eup %2290  ;;  %v3511_v33 = vmul.f32 0.0051020407, %v3231_v0  ;;  %v1152_v47 = vld [vmem:[%s3316_s22 + $0x80] sm:$0xff] }
 0x13f   : > { %v743_v40 = vpop.xlane.xlu1 %742  ;;  %v1066_v50 = vadd.f32 1e-05, %v1018_v56  ;;  %v1020_v38 = vmax.f32 %v972_v39, 0.0  ;;  %v974_v37 = vsub.f32 %v878_v5, %v926_v43  ;;  %v3517_v48 = vmul.f32 0.0051020407, %v3233_v52  ;;  %v1161_v39 = vld [vmem:[%s3316_s22 + $0xc8] sm:$0xff] }
 0x140   : > { %4501 = vst [vmem:[#allocation33_spill] sm:$0xff] %v3511_v33  ;;  %2304 = vrsqrt.f32 %v1069_v1  ;;  %v1023_v3 = vmax.f32 %v975_v35, 0.0  ;;  %v881_v2 = vmul.f32 0.0051020407, %v743_v40  ;;  %v739_v6 = vpop.xlane.xlu0 %738  ;;  %1483 = vperm.xlu0 %2250, %v3503_v18   ;;  %v928_v35 = vmul.f32 %v3501_v36, %v3501_v36 }
 0x141   : > { %v2293_v61 = vpop.eup %2292  ;;  %v880_v4 = vmul.f32 0.0051020407, %v739_v6  ;;  %1448 = vperm.xlu1 %2251, %v3507_v16   ;;  %4502 = vst [vmem:[#allocation34_spill] sm:$0xff] %v3517_v48  ;;  %v3524_v40 = vmul.f32 0.0051020407, %v3235_v13  ;;  %2306 = vrsqrt.f32 %v1064_v26  ;;  %v3526_v43 = vmul.f32 %v2291_v31, %v1152_v47 }
 0x142   : > { %v1071_v0 = vadd.f32 1e-05, %v1023_v3  ;;  %v977_v17 = vsub.f32 %v881_v2, %v929_v7  ;;  %v3519_v1 = vmul.f32 %v2293_v61, %v1159_v28  ;;  %v2295_v5 = vpop.eup %2294  ;;  %v931_v52 = vmul.f32 %v3511_v33, %v3511_v33  ;;  %v1154_v2 = vld [vmem:[%s3316_s22 + $0x90] sm:$0xff] }
 0x143   : > { %4503 = vst [vmem:[#allocation35_spill] sm:$0xff] %v3524_v40  ;;  %v751_v56 = vpop.xlane.xlu1 %750  ;;  %v1068_v13 = vadd.f32 1e-05, %v1020_v38  ;;  %v1022_v26 = vmax.f32 %v974_v37, 0.0  ;;  %v976_v61 = vsub.f32 %v880_v4, %v928_v35  ;;  %v930_v31 = vmul.f32 %v3517_v48, %v3517_v48  ;;  %v1163_v4 = vld [vmem:[%s3316_s22 + $0xd8] sm:$0xff] }
 0x144   : > { %2308 = vrsqrt.f32 %v1071_v0  ;;  %v1025_v3 = vmax.f32 %v977_v17, 0.0  ;;  %v883_v7 = vmul.f32 0.0051020407, %v751_v56  ;;  %v747_v28 = vpop.xlane.xlu0 %746  ;;  %1493 = vperm.xlu0 %2250, %v3519_v1   ;;  %v933_v56 = vmul.f32 %v3524_v40, %v3524_v40 }
 0x145   : > { %v2297_v6 = vpop.eup %2296  ;;  %2310 = vrsqrt.f32 %v1066_v50  ;;  %1458 = vperm.xlu1 %2251, %v3526_v43   ;;  %v3541_v36 = vmul.f32 0.0051020407, %v3237_v58  ;;  %v882_v50 = vmul.f32 0.0051020407, %v747_v28  ;;  %v3543_v37 = vmul.f32 %v2295_v5, %v1154_v2 }
 0x146   : > { %v1073_v47 = vadd.f32 1e-05, %v1025_v3  ;;  %v979_v0 = vsub.f32 %v883_v7, %v931_v52  ;;  %v3536_v17 = vmul.f32 %v2297_v6, %v1161_v39  ;;  %v2299_v35 = vpop.eup %2298  ;;  %v3547_v59 = vmul.f32 0.0051020407, %v3239_v15  ;;  %v1156_v7 = vld [vmem:[%s3316_s22 + $0xa0] sm:$0xff] }
 0x147   : > { %4504 = vst [vmem:[#allocation36_spill] sm:$0xff] %v3541_v36  ;;  %v759_v38 = vpop.xlane.xlu1 %758  ;;  %v3552_v58 = vmul.f32 0.0051020407, %v3241_v21  ;;  %v1070_v5 = vadd.f32 1e-05, %v1022_v26  ;;  %v1024_v28 = vmax.f32 %v976_v61, 0.0  ;;  %v3560_v46 = vmul.f32 %v2299_v35, %v1156_v7 }
 0x148   : > { %4505 = vst [vmem:[#allocation37_spill] sm:$0xff] %v3547_v59  ;;  %2312 = vrsqrt.f32 %v1073_v47  ;;  %v1027_v3 = vmax.f32 %v979_v0, 0.0  ;;  %v885_v52 = vmul.f32 0.0051020407, %v759_v38  ;;  %v755_v39 = vpop.xlane.xlu0 %754  ;;  %1503 = vperm.xlu0 %2250, %v3536_v17   ;;  %v3558_v0 = vmul.f32 0.0051020407, %v3243_v60 }
 0x149   : > { %v2301_v6 = vpop.eup %2300  ;;  %4506 = vst [vmem:[#allocation38_spill] sm:$0xff] %v3552_v58  ;;  %2314 = vrsqrt.f32 %v1068_v13  ;;  %1468 = vperm.xlu1 %2251, %v3543_v37   ;;  %v978_v38 = vsub.f32 %v882_v50, %v930_v31  ;;  %v884_v48 = vmul.f32 0.0051020407, %v755_v39  ;;  %v1165_v21 = vld [vmem:[%s3316_s22 + $0xe8] sm:$0xff]  ;;  %v935_v13 = vmul.f32 %v3547_v59, %v3547_v59  ;;  %v1167_v59 = vld [vmem:[%s3316_s22 + $0xf8] sm:$0xff] }
 0x14a   : > { %v1075_v2 = vadd.f32 1e-05, %v1027_v3  ;;  %v981_v15 = vsub.f32 %v885_v52, %v933_v56  ;;  %v3555_v47 = vmul.f32 %v2301_v6, %v1163_v4  ;;  %4507 = vst [vmem:[#allocation39_spill] sm:$0xff] %v3558_v0  ;;  %v2303_v33 = vpop.eup %2302  ;;  %v1158_v56 = vld [vmem:[%s3316_s22 + $0xb0] sm:$0xff]  ;;  %v932_v31 = vmul.f32 %v3541_v36, %v3541_v36 }
 0x14b   : > { %v767_v40 = vpop.xlane.xlu1 %766  ;;  %v934_v50 = vmul.f32 %v3552_v58, %v3552_v58  ;;  %v1072_v4 = vadd.f32 1e-05, %v1024_v28  ;;  %v937_v7 = vmul.f32 %v3558_v0, %v3558_v0  ;;  %v1026_v6 = vmax.f32 %v978_v38, 0.0 }
 0x14c   : > { %2316 = vrsqrt.f32 %v1075_v2  ;;  %v1029_v26 = vmax.f32 %v981_v15, 0.0  ;;  %v887_v61 = vmul.f32 0.0051020407, %v767_v40  ;;  %v763_v3 = vpop.xlane.xlu0 %762  ;;  %1513 = vperm.xlu0 %2250, %v3555_v47   ;;  %v980_v2 = vsub.f32 %v884_v48, %v932_v31  ;;  %v1162_v31 = vld [vmem:[%s3316_s22 + $0xd0] sm:$0xff] }
 0x14d   : > { %v2305_v60 = vpop.eup %2304  ;;  %2318 = vrsqrt.f32 %v1070_v5  ;;  %1478 = vperm.xlu1 %2251, %v3560_v46   ;;  %v886_v40 = vmul.f32 0.0051020407, %v763_v3  ;;  %v3576_v36 = vmul.f32 %v2303_v33, %v1158_v56  ;;  %v3580_v5 = vmul.f32 0.0051020407, %v3247_v8 }
 0x14e   : > { %v1077_v35 = vadd.f32 1e-05, %v1029_v26  ;;  %v983_v52 = vsub.f32 %v887_v61, %v935_v13  ;;  %v3572_v39 = vmul.f32 %v2305_v60, %v1165_v21  ;;  %v2307_v58 = vpop.eup %2306  ;;  %v1160_v21 = vld [vmem:[%s3316_s22 + $0xc0] sm:$0xff]  ;;  %v3585_v48 = vmul.f32 0.0051020407, %v3245_v62  ;;  %v1169_v62 = vld [vmem:[%s3316_s22 + $0x108] sm:$0xff] }
 0x14f   : > { %v775_v15 = vpop.xlane.xlu1 %774  ;;  %4508 = vst [vmem:[#allocation40_spill] sm:$0xff] %v3580_v5  ;;  %v3588_v33 = vmul.f32 0.0051020407, %v3251_v20  ;;  %v982_v3 = vsub.f32 %v886_v40, %v934_v50  ;;  %v3594_v44 = vmul.f32 %v2307_v58, %v1160_v21  ;;  %v939_v20 = vmul.f32 %v3580_v5, %v3580_v5  ;;  %v1164_v21 = vld [vmem:[%s3316_s22 + $0xe0] sm:$0xff] }
 0x150   : > { %2320 = vrsqrt.f32 %v1077_v35  ;;  %v1031_v28 = vmax.f32 %v983_v52, 0.0  ;;  %v889_v13 = vmul.f32 0.0051020407, %v775_v15  ;;  %v771_v26 = vpop.xlane.xlu0 %770  ;;  %1523 = vperm.xlu0 %2250, %v3572_v39   ;;  %4509 = vst [vmem:[#allocation41_spill] sm:$0xff] %v3585_v48  ;;  %v1074_v35 = vadd.f32 1e-05, %v1026_v6 }
 0x151   : > { %v2309_v61 = vpop.eup %2308  ;;  %4510 = vst [vmem:[#allocation42_spill] sm:$0xff] %v3588_v33  ;;  %2322 = vrsqrt.f32 %v1072_v4  ;;  %1488 = vperm.xlu1 %2251, %v3576_v36   ;;  %v1028_v52 = vmax.f32 %v980_v2, 0.0  ;;  %v888_v15 = vmul.f32 0.0051020407, %v771_v26  ;;  %v936_v50 = vmul.f32 %v3585_v48, %v3585_v48  ;;  %v1171_v48 = vld [vmem:[%s3316_s22 + $0x118] sm:$0xff] }
 0x152   : > { %v2311_v8 = vpop.eup %2310  ;;  %v1079_v38 = vadd.f32 1e-05, %v1031_v28  ;;  %v985_v56 = vsub.f32 %v889_v13, %v937_v7  ;;  %v3591_v60 = vmul.f32 %v2309_v61, %v1167_v59  ;;  %v3603_v40 = vmul.f32 0.0051020407, %v3249_v51 }
 0x153   : > { %v783_v0 = vpop.xlane.xlu1 %782  ;;  %v941_v58 = vmul.f32 %v3588_v33, %v3588_v33  ;;  %v3608_v7 = vmul.f32 %v2311_v8, %v1162_v31  ;;  %v1076_v61 = vadd.f32 1e-05, %v1028_v52  ;;  %v3615_v5 = vmul.f32 0.0051020407, %v3255_v12 }
 0x154   : > { %2324 = vrsqrt.f32 %v1079_v38  ;;  %v1033_v4 = vmax.f32 %v985_v56, 0.0  ;;  %v891_v19 = vmul.f32 0.0051020407, %v783_v0  ;;  %v779_v28 = vpop.xlane.xlu0 %778  ;;  %1533 = vperm.xlu0 %2250, %v3591_v60   ;;  %4511 = vst [vmem:[#allocation43_spill] sm:$0xff] %v3603_v40  ;;  %v1030_v0 = vmax.f32 %v982_v3, 0.0 }
 0x155   : > { %v2313_v59 = vpop.eup %2312  ;;  %1498 = vperm.xlu1 %2251, %v3594_v44   ;;  %2326 = vrsqrt.f32 %v1074_v35  ;;  %v984_v38 = vsub.f32 %v888_v15, %v936_v50  ;;  %v890_v56 = vmul.f32 0.0051020407, %v779_v28  ;;  %v938_v3 = vmul.f32 %v3603_v40, %v3603_v40  ;;  %v1166_v28 = vld [vmem:[%s3316_s22 + $0xf0] sm:$0xff] }
 0x156   : > { %v2315_v6 = vpop.eup %2314  ;;  %v1081_v2 = vadd.f32 1e-05, %v1033_v4  ;;  %v987_v13 = vsub.f32 %v891_v19, %v939_v20  ;;  %v3610_v26 = vmul.f32 %v2313_v59, %v1169_v62  ;;  %v3621_v35 = vmul.f32 0.0051020407, %v3253_v9 }
 0x157   : > { %v791_v51 = vpop.xlane.xlu1 %790  ;;  %v3624_v52 = vmul.f32 %v2315_v6, %v1164_v21  ;;  %v1078_v15 = vadd.f32 1e-05, %v1030_v0  ;;  %v1032_v59 = vmax.f32 %v984_v38, 0.0  ;;  %v986_v50 = vsub.f32 %v890_v56, %v938_v3 }
 0x158   : > { %2328 = vrsqrt.f32 %v1081_v2  ;;  %v1035_v8 = vmax.f32 %v987_v13, 0.0  ;;  %v893_v31 = vmul.f32 0.0051020407, %v791_v51  ;;  %v787_v33 = vpop.xlane.xlu0 %786  ;;  %1543 = vperm.xlu0 %2250, %v3610_v26   ;;  %v1173_v51 = vld [vmem:[%s3316_s22 + $0x128] sm:$0xff]  ;;  %v943_v9 = vmul.f32 %v3615_v5, %v3615_v5 }
 0x159   : > { %v2317_v19 = vpop.eup %2316  ;;  %1508 = vperm.xlu1 %2251, %v3608_v7   ;;  %2330 = vrsqrt.f32 %v1076_v61  ;;  %v892_v2 = vmul.f32 0.0051020407, %v787_v33  ;;  %v3636_v0 = vmul.f32 0.0051020407, %v3260_v24  ;;  %v1034_v3 = vmax.f32 %v986_v50, 0.0 }
 0x15a   : > { %v2319_v12 = vpop.eup %2318  ;;  %v1083_v62 = vadd.f32 1e-05, %v1035_v8  ;;  %v989_v20 = vsub.f32 %v893_v31, %v941_v58  ;;  %v3626_v4 = vmul.f32 %v2317_v19, %v1171_v48  ;;  %v940_v58 = vmul.f32 %v3621_v35, %v3621_v35  ;;  %v1168_v31 = vld [vmem:[%s3316_s22 + $0x100] sm:$0xff] }
 0x15b   : > { %v799_v13 = vpop.xlane.xlu1 %798  ;;  %v3639_v33 = vmul.f32 %v2319_v12, %v1166_v28  ;;  %v1080_v19 = vadd.f32 1e-05, %v1032_v59 }
 0x15c   : > { %2332 = vrsqrt.f32 %v1083_v62  ;;  %v1037_v6 = vmax.f32 %v989_v20, 0.0  ;;  %v895_v21 = vmul.f32 0.0051020407, %v799_v13  ;;  %v795_v40 = vpop.xlane.xlu0 %794  ;;  %1553 = vperm.xlu0 %2250, %v3626_v4   ;;  %v988_v62 = vsub.f32 %v892_v2, %v940_v58  ;;  %v1175_v13 = vld [vmem:[%s3316_s22 + $0x138] sm:$0xff] }
 0x15d   : > { %v2321_v48 = vpop.eup %2320  ;;  %1518 = vperm.xlu1 %2251, %v3624_v52   ;;  %2334 = vrsqrt.f32 %v1078_v15  ;;  %v894_v20 = vmul.f32 0.0051020407, %v795_v40  ;;  %v942_v15 = vmul.f32 %v3636_v0, %v3636_v0  ;;  %v1082_v40 = vadd.f32 1e-05, %v1034_v3  ;;  %v1172_v3 = vld [vmem:[%s3316_s22 + $0x120] sm:$0xff] }
 0x15e   : > { %v2323_v61 = vpop.eup %2322  ;;  %v1085_v38 = vadd.f32 1e-05, %v1037_v6  ;;  %v991_v56 = vsub.f32 %v895_v21, %v943_v9  ;;  %v3641_v8 = vmul.f32 %v2321_v48, %v1173_v51  ;;  %v1036_v50 = vmax.f32 %v988_v62, 0.0  ;;  %v1177_v9 = vld [vmem:[%s3316_s22 + $0x148] sm:$0xff]  ;;  %v1170_v21 = vld [vmem:[%s3316_s22 + $0x110] sm:$0xff] }
 0x15f   : > { %v3651_v59 = vmul.f32 %v2323_v61, %v1168_v31  ;;  %v990_v2 = vsub.f32 %v894_v20, %v942_v15  ;;  %v1179_v31 = vld [vmem:[%s3316_s22 + $0x158] sm:$0xff]  ;;  %v1181_v15 = vld [vmem:[%s3316_s22 + $0x168] sm:$0xff] }
 0x160   : > { %2336 = vrsqrt.f32 %v1085_v38  ;;  %v1039_v24 = vmax.f32 %v991_v56, 0.0  ;;  %1563 = vperm.xlu0 %2250, %v3641_v8   ;;  %v1084_v61 = vadd.f32 1e-05, %v1036_v50 }
 0x161   : > { %v2325_v12 = vpop.eup %2324  ;;  %1528 = vperm.xlu1 %2251, %v3639_v33   ;;  %2338 = vrsqrt.f32 %v1080_v19  ;;  %v1038_v38 = vmax.f32 %v990_v2, 0.0 }
 0x162   : > { %v1087_v28 = vadd.f32 1e-05, %v1039_v24  ;;  %v3649_v51 = vmul.f32 %v2325_v12, %v1175_v13  ;;  %v2327_v6 = vpop.eup %2326 }
 0x163   : > { %v3659_v56 = vmul.f32 %v2327_v6, %v1170_v21  ;;  %v1086_v24 = vadd.f32 1e-05, %v1038_v38  ;;  %v1176_v21 = vld [vmem:[%s3316_s22 + $0x140] sm:$0xff] }
 0x164   : > { %2340 = vrsqrt.f32 %v1087_v28  ;;  %1573 = vperm.xlu0 %2250, %v3649_v51   ;;  %v1174_v28 = vld [vmem:[%s3316_s22 + $0x130] sm:$0xff] }
 0x165   : > { %v2329_v48 = vpop.eup %2328  ;;  %1538 = vperm.xlu1 %2251, %v3651_v59   ;;  %2342 = vrsqrt.f32 %v1082_v40 }
 0x166   : > { %v3657_v58 = vmul.f32 %v2329_v48, %v1177_v9  ;;  %v2331_v19 = vpop.eup %2330  ;;  %2344 = vrsqrt.f32 %v1084_v61  ;;  %v1183_v9 = vld [vmem:[%s3316_s22 + $0x178] sm:$0xff]  ;;  %v1281_v61 = vmul.f32 %v3335_v23, %v3258_v45 }
 0x167   : > { %v3667_v12 = vmul.f32 %v2331_v19, %v1172_v3  ;;  %2346 = vrsqrt.f32 %v1086_v24  ;;  %v1233_v19 = vld [vmem:[%s3683_s25 + $0x8] sm:$0xff]  ;;  %v1235_v45 = vld [vmem:[%s3683_s25 + $0x18] sm:$0xff] }
 0x168   : > { %1583 = vperm.xlu0 %2250, %v3657_v58   ;;  %v4512_v24 = vld [vmem:[#allocation3_spill] sm:$0xff] }
 0x169   : > { %v2333_v62 = vpop.eup %2332  ;;  %1548 = vperm.xlu1 %2251, %v3659_v56  }
 0x16a   : > { %v3665_v20 = vmul.f32 %v2333_v62, %v1179_v31  ;;  %v2335_v13 = vpop.eup %2334  ;;  %v1178_v62 = vld [vmem:[%s3316_s22 + $0x150] sm:$0xff] }
 0x16b   : > { %v3675_v2 = vmul.f32 %v2335_v13, %v1174_v28  ;;  %v1329_v13 = vsub.f32 %v1233_v19, %v1281_v61 }
 0x16c   : > { %1593 = vperm.xlu0 %2250, %v3665_v20  }
 0x16d   : > { %v2337_v40 = vpop.eup %2336  ;;  %1558 = vperm.xlu1 %2251, %v3667_v12  }
 0x16e   : > { %v3673_v50 = vmul.f32 %v2337_v40, %v1181_v15  ;;  %v2339_v6 = vpop.eup %2338  ;;  %v1283_v15 = vmul.f32 %v3368_v11, %v4512_v24  ;;  %v1180_v40 = vld [vmem:[%s3316_s22 + $0x160] sm:$0xff]  ;;  %v1182_v11 = vld [vmem:[%s3316_s22 + $0x170] sm:$0xff] }
 0x16f   : > { %v3692_v31 = vmul.f32 %v2339_v6, %v1176_v21  ;;  %v1285_v6 = vmul.f32 %v3399_v63, %v3276_v42  ;;  %v1239_v42 = vld [vmem:[%s3683_s25 + $0x38] sm:$0xff]  ;;  %v1232_v63 = vld [vmem:[%s3683_s25] sm:$0xff] }
 0x170   : > { %1603 = vperm.xlu0 %2250, %v3673_v50  }
 0x171   : > { %v2341_v48 = vpop.eup %2340  ;;  %1568 = vperm.xlu1 %2251, %v3675_v2  }
 0x172   : > { %v3690_v38 = vmul.f32 %v2341_v48, %v1183_v9  ;;  %v2343_v3 = vpop.eup %2342  ;;  %v1331_v9 = vsub.f32 %v1235_v45, %v1283_v15  ;;  %v1237_v48 = vld [vmem:[%s3683_s25 + $0x28] sm:$0xff] }
 0x173   : > { %v3700_v28 = vmul.f32 %v2343_v3, %v1178_v62  ;;  %v2345_v23 = vpop.eup %2344  ;;  %v1333_v19 = vsub.f32 %v1237_v48, %v1285_v6  ;;  %v4513_v3 = vld [vmem:[#allocation7_spill] sm:$0xff]  ;;  %v4516_v48 = vld [vmem:[#allocation4_spill] sm:$0xff] }
 0x174   : > { %1613 = vperm.xlu0 %2250, %v3690_v38   ;;  %v3707_v21 = vmul.f32 %v2345_v23, %v1180_v40  ;;  %v2347_v61 = vpop.eup %2346  ;;  %v1287_v62 = vmul.f32 %v3433_v22, %v4513_v3  ;;  %v4515_v23 = vld [vmem:[#allocation8_spill] sm:$0xff]  ;;  %v1241_v6 = vld [vmem:[%s3683_s25 + $0x48] sm:$0xff]  ;;  %v1282_v22 = vmul.f32 %v3355_v29, %v4516_v48  ;;  %v1293_v29 = vmul.f32 %v3435_v54, %v3324_v53  ;;  %v1240_v53 = vld [vmem:[%s3683_s25 + $0x40] sm:$0xff] }
 0x175   : > { %1578 = vperm.xlu1 %2251, %v3692_v31   ;;  %v3716_v15 = vmul.f32 %v2347_v61, %v1182_v11  ;;  %v1289_v40 = vmul.f32 %v3395_v41, %v4515_v23  ;;  %v4517_v11 = vld [vmem:[#allocation10_spill] sm:$0xff] }
 0x176   : > { %v1335_v45 = vsub.f32 %v1239_v42, %v1287_v62  ;;  %v4518_v62 = vld [vmem:[#allocation5_spill] sm:$0xff]  ;;  %v4519_v23 = vld [vmem:[#allocation6_spill] sm:$0xff] }
 0x177   : > { %v1337_v61 = vsub.f32 %v1241_v6, %v1289_v40  ;;  %v1284_v41 = vmul.f32 %v3383_v32, %v4518_v62  ;;  %v1286_v40 = vmul.f32 %v3419_v55, %v4519_v23  ;;  %v4520_v32 = vld [vmem:[#allocation13_spill] sm:$0xff]  ;;  %v4522_v55 = vld [vmem:[#allocation15_spill] sm:$0xff] }
 0x178   : > { %1719 = vperm.xlu0 %2250, %v1329_v13   ;;  %v4514_v13 = vld [vmem:[#allocation2_spill] sm:$0xff]  ;;  %v1295_v6 = vmul.f32 %v3454_v57, %v4520_v32  ;;  %v4523_v62 = vld [vmem:[#allocation11_spill] sm:$0xff] }
 0x179   : > { %1588 = vperm.xlu1 %2251, %v3700_v28   ;;  %v1280_v24 = vmul.f32 %v3339_v34, %v4514_v13  ;;  %v1234_v34 = vld [vmem:[%s3683_s25 + $0x10] sm:$0xff]  ;;  %v1243_v13 = vld [vmem:[%s3683_s25 + $0x58] sm:$0xff]  ;;  %v1290_v57 = vmul.f32 %v3471_v27, %v4523_v62 }
 0x17a   : > { %v1330_v3 = vsub.f32 %v1234_v34, %v1282_v22  ;;  %v1247_v22 = vld [vmem:[%s3683_s25 + $0x78] sm:$0xff] }
 0x17b   : > { %v4521_v34 = vld [vmem:[#allocation9_spill] sm:$0xff]  ;;  %v1343_v54 = vsub.f32 %v1247_v22, %v1295_v6  ;;  %v1253_v6 = vld [vmem:[%s3683_s25 + $0xa8] sm:$0xff] }
 0x17c   : > { %1729 = vperm.xlu0 %2250, %v1331_v9   ;;  %v1328_v9 = vsub.f32 %v1232_v63, %v1280_v24  ;;  %v1236_v24 = vld [vmem:[%s3683_s25 + $0x20] sm:$0xff] }
 0x17d   : > { %1598 = vperm.xlu1 %2251, %v3707_v21   ;;  %v1332_v63 = vsub.f32 %v1236_v24, %v1284_v41  ;;  %v1242_v41 = vld [vmem:[%s3683_s25 + $0x50] sm:$0xff]  ;;  %v4524_v24 = vld [vmem:[#allocation17_spill] sm:$0xff] }
 0x180   : > { %1739 = vperm.xlu0 %2250, %v1333_v19   ;;  %v1291_v19 = vmul.f32 %v3416_v49, %v4517_v11  ;;  %v1238_v49 = vld [vmem:[%s3683_s25 + $0x30] sm:$0xff]  ;;  %v1297_v11 = vmul.f32 %v3469_v30, %v4522_v55  ;;  %v1255_v55 = vld [vmem:[%s3683_s25 + $0xb8] sm:$0xff] }
 0x181   : > { %1608 = vperm.xlu1 %2251, %v3716_v15   ;;  %v1334_v48 = vsub.f32 %v1238_v49, %v1286_v40  ;;  %v1244_v40 = vld [vmem:[%s3683_s25 + $0x60] sm:$0xff]  ;;  %v4526_v49 = vld [vmem:[#allocation19_spill] sm:$0xff] }
 0x182   : > { %v1339_v42 = vsub.f32 %v1243_v13, %v1291_v19  ;;  %v1249_v13 = vld [vmem:[%s3683_s25 + $0x88] sm:$0xff] }
 0x184   : > { %1749 = vperm.xlu0 %2250, %v1335_v45   ;;  %v1245_v45 = vld [vmem:[%s3683_s25 + $0x68] sm:$0xff] }
 0x185   : > { %1714 = vperm.xlu1 %2251, %v1328_v9   ;;  %v1341_v9 = vsub.f32 %v1245_v45, %v1293_v29  ;;  %v1338_v29 = vsub.f32 %v1242_v41, %v1290_v57  ;;  %v4525_v45 = vld [vmem:[#allocation12_spill] sm:$0xff]  ;;  %v4530_v57 = vld [vmem:[#allocation23_spill] sm:$0xff] }
 0x186   : > { %v1292_v30 = vmul.f32 %v3490_v14, %v4525_v45  ;;  %v1246_v14 = vld [vmem:[%s3683_s25 + $0x70] sm:$0xff]  ;;  %v1305_v41 = vmul.f32 %v3536_v17, %v4530_v57  ;;  %v1263_v57 = vld [vmem:[%s3683_s25 + $0xf8] sm:$0xff] }
 0x188   : > { %1759 = vperm.xlu0 %2250, %v1337_v61   ;;  %v1288_v61 = vmul.f32 %v3452_v25, %v4521_v34  ;;  %v1345_v25 = vsub.f32 %v1249_v13, %v1297_v11  ;;  %v1340_v32 = vsub.f32 %v1244_v40, %v1292_v30  ;;  %v4529_v11 = vld [vmem:[#allocation16_spill] sm:$0xff]  ;;  %v4532_v30 = vld [vmem:[#allocation25_spill] sm:$0xff] }
 0x189   : > { %1724 = vperm.xlu1 %2251, %v1330_v3   ;;  %v1307_v40 = vmul.f32 %v3555_v47, %v4532_v30  ;;  %v1265_v30 = vld [vmem:[%s3683_s25 + $0x108] sm:$0xff] }
 0x18a   : > { %v1336_v3 = vsub.f32 %v1240_v53, %v1288_v61  ;;  %v4528_v61 = vld [vmem:[#allocation21_spill] sm:$0xff] }
 0x18b   : > { %v1303_v53 = vmul.f32 %v3519_v1, %v4528_v61  ;;  %v1261_v61 = vld [vmem:[%s3683_s25 + $0xe8] sm:$0xff] }
 0x18c   : > { %1769 = vperm.xlu0 %2250, %v1339_v42   ;;  %v1299_v42 = vmul.f32 %v3488_v10, %v4524_v24  ;;  %v1257_v24 = vld [vmem:[%s3683_s25 + $0xc8] sm:$0xff] }
 0x18d   : > { %1734 = vperm.xlu1 %2251, %v1332_v63   ;;  %v1251_v63 = vld [vmem:[%s3683_s25 + $0x98] sm:$0xff]  ;;  %v1351_v62 = vsub.f32 %v1255_v55, %v1303_v53  ;;  %v1353_v45 = vsub.f32 %v1257_v24, %v1305_v41  ;;  %v4535_v53 = vld [vmem:[#allocation22_spill] sm:$0xff]  ;;  %v4537_v41 = vld [vmem:[#allocation24_spill] sm:$0xff] }
 0x18e   : > { %v1347_v27 = vsub.f32 %v1251_v63, %v1299_v42  ;;  %v4531_v42 = vld [vmem:[#allocation18_spill] sm:$0xff] }
 0x190   : > { %1779 = vperm.xlu0 %2250, %v1341_v9   ;;  %v1301_v9 = vmul.f32 %v3503_v18, %v4526_v49  ;;  %v1259_v49 = vld [vmem:[%s3683_s25 + $0xd8] sm:$0xff] }
 0x191   : > { %1744 = vperm.xlu1 %2251, %v1334_v48   ;;  %v4527_v48 = vld [vmem:[#allocation14_spill] sm:$0xff] }
 0x192   : > { %v1294_v10 = vmul.f32 %v3507_v16, %v4527_v48  ;;  %v1349_v34 = vsub.f32 %v1253_v6, %v1301_v9  ;;  %v1248_v16 = vld [vmem:[%s3683_s25 + $0x80] sm:$0xff]  ;;  %v4533_v9 = vld [vmem:[#allocation20_spill] sm:$0xff]  ;;  %v1355_v48 = vsub.f32 %v1259_v49, %v1307_v40 }
 0x193   : > { %v3747_v19 = vpop.permute.xlu1 %1383  ;;  %v4539_v40 = vld [vmem:[#allocation26_spill] sm:$0xff] }
 0x194   : > { %1789 = vperm.xlu0 %2250, %v1343_v54   ;;  %v3771_v54 = vpop.permute.xlu0 %1378  ;;  %v1342_v18 = vsub.f32 %v1246_v14, %v1294_v10  ;;  %v4534_v10 = vld [vmem:[#allocation27_spill] sm:$0xff] }
 0x195   : > { %1754 = vperm.xlu1 %2251, %v1336_v3   ;;  %v1296_v3 = vmul.f32 %v3526_v43, %v4529_v11  ;;  %v1250_v43 = vld [vmem:[%s3683_s25 + $0x90] sm:$0xff]  ;;  %v1309_v14 = vmul.f32 %v3572_v39, %v4534_v10  ;;  %v1267_v10 = vld [vmem:[%s3683_s25 + $0x118] sm:$0xff] }
 0x197   : > { %v1344_v1 = vsub.f32 %v1248_v16, %v1296_v3  ;;  %v1357_v11 = vsub.f32 %v1261_v61, %v1309_v14  ;;  %v4536_v3 = vld [vmem:[#allocation29_spill] sm:$0xff]  ;;  %v4541_v14 = vld [vmem:[#allocation28_spill] sm:$0xff] }
 0x198   : > { %v3758_v23 = vpop.permute.xlu1 %1388  ;;  %1799 = vperm.xlu0 %2250, %v1345_v25   ;;  %v1311_v16 = vmul.f32 %v3591_v60, %v4536_v3  ;;  %v1269_v3 = vld [vmem:[%s3683_s25 + $0x128] sm:$0xff] }
 0x199   : > { %1764 = vperm.xlu1 %2251, %v1338_v29   ;;  %v1298_v29 = vmul.f32 %v3543_v37, %v4531_v42  ;;  %v1252_v37 = vld [vmem:[%s3683_s25 + $0xa0] sm:$0xff] }
 0x19a   : > { %v1359_v42 = vsub.f32 %v1263_v57, %v1311_v16  ;;  %v4543_v16 = vld [vmem:[#allocation30_spill] sm:$0xff] }
 0x19b   : > { %v1346_v17 = vsub.f32 %v1250_v43, %v1298_v29  ;;  %v4538_v29 = vld [vmem:[#allocation31_spill] sm:$0xff] }
 0x19c   : > { %v3766_v22 = vpop.permute.xlu1 %1393  ;;  %1809 = vperm.xlu0 %2250, %v1347_v27   ;;  %v1313_v43 = vmul.f32 %v3610_v26, %v4538_v29  ;;  %v1271_v29 = vld [vmem:[%s3683_s25 + $0x138] sm:$0xff] }
 0x19d   : > { %1774 = vperm.xlu1 %2251, %v1340_v32   ;;  %v1300_v32 = vmul.f32 %v3560_v46, %v4533_v9  ;;  %v1254_v46 = vld [vmem:[%s3683_s25 + $0xb0] sm:$0xff] }
 0x19e   : > { %v1361_v9 = vsub.f32 %v1265_v30, %v1313_v43  ;;  %v4545_v43 = vld [vmem:[#allocation32_spill] sm:$0xff] }
 0x19f   : > { %v1348_v47 = vsub.f32 %v1252_v37, %v1300_v32  ;;  %v4540_v32 = vld [vmem:[#allocation33_spill] sm:$0xff] }
 0x1a0   : > { %v3776_v13 = vpop.permute.xlu1 %1398  ;;  %1819 = vperm.xlu0 %2250, %v1349_v34   ;;  %v1315_v37 = vmul.f32 %v3626_v4, %v4540_v32  ;;  %v1273_v32 = vld [vmem:[%s3683_s25 + $0x148] sm:$0xff] }
 0x1a1   : > { %1784 = vperm.xlu1 %2251, %v1342_v18   ;;  %v1302_v18 = vmul.f32 %v3576_v36, %v4535_v53  ;;  %v1256_v36 = vld [vmem:[%s3683_s25 + $0xc0] sm:$0xff] }
 0x1a2   : > { %v1363_v53 = vsub.f32 %v1267_v10, %v1315_v37  ;;  %v4547_v37 = vld [vmem:[#allocation34_spill] sm:$0xff] }
 0x1a3   : > { %v3781_v25 = vpop.permute.xlu0 %1423  ;;  %v1350_v39 = vsub.f32 %v1254_v46, %v1302_v18  ;;  %v4542_v18 = vld [vmem:[#allocation35_spill] sm:$0xff] }
 0x1a4   : > { %v3786_v63 = vpop.permute.xlu1 %1403  ;;  %1829 = vperm.xlu0 %2250, %v1351_v62   ;;  %v1317_v46 = vmul.f32 %v3641_v8, %v4542_v18  ;;  %v1275_v18 = vld [vmem:[%s3683_s25 + $0x158] sm:$0xff] }
 0x1a5   : > { %1794 = vperm.xlu1 %2251, %v1344_v1   ;;  %v1304_v1 = vmul.f32 %v3594_v44, %v4537_v41  ;;  %v1258_v44 = vld [vmem:[%s3683_s25 + $0xd0] sm:$0xff] }
 0x1a6   : > { %v1365_v41 = vsub.f32 %v1269_v3, %v1317_v46  ;;  %v4549_v46 = vld [vmem:[#allocation36_spill] sm:$0xff] }
 0x1a7   : > { %v3791_v27 = vpop.permute.xlu0 %1433  ;;  %v1352_v60 = vsub.f32 %v1256_v36, %v1304_v1  ;;  %v4544_v1 = vld [vmem:[#allocation37_spill] sm:$0xff] }
 0x1a8   : > { %v3796_v6 = vpop.permute.xlu1 %1408  ;;  %1839 = vperm.xlu0 %2250, %v1353_v45   ;;  %v1319_v36 = vmul.f32 %v3649_v51, %v4544_v1  ;;  %v1277_v1 = vld [vmem:[%s3683_s25 + $0x168] sm:$0xff] }
 0x1a9   : > { %1804 = vperm.xlu1 %2251, %v1346_v17   ;;  %v1306_v17 = vmul.f32 %v3608_v7, %v4539_v40  ;;  %v1260_v7 = vld [vmem:[%s3683_s25 + $0xe0] sm:$0xff] }
 0x1aa   : > { %v1367_v40 = vsub.f32 %v1271_v29, %v1319_v36  ;;  %v4551_v36 = vld [vmem:[#allocation38_spill] sm:$0xff] }
 0x1ab   : > { %v3801_v34 = vpop.permute.xlu0 %1443  ;;  %v1354_v26 = vsub.f32 %v1258_v44, %v1306_v17  ;;  %v4546_v17 = vld [vmem:[#allocation39_spill] sm:$0xff] }
 0x1ac   : > { %v3806_v55 = vpop.permute.xlu1 %1413  ;;  %1849 = vperm.xlu0 %2250, %v1355_v48   ;;  %v1321_v44 = vmul.f32 %v3657_v58, %v4546_v17  ;;  %v4552_v17 = vld [vmem:[#allocation41_spill] sm:$0xff] }
 0x1ad   : > { %1814 = vperm.xlu1 %2251, %v1348_v47   ;;  %v1308_v47 = vmul.f32 %v3624_v52, %v4541_v14  ;;  %v1262_v52 = vld [vmem:[%s3683_s25 + $0xf0] sm:$0xff] }
 0x1ae   : > { %v1369_v14 = vsub.f32 %v1273_v32, %v1321_v44  ;;  %v1320_v44 = vmul.f32 %v3692_v31, %v4552_v17 }
 0x1af   : > { %v3811_v62 = vpop.permute.xlu0 %1453  ;;  %v1356_v4 = vsub.f32 %v1260_v7, %v1308_v47  ;;  %v4548_v47 = vld [vmem:[#allocation40_spill] sm:$0xff] }
 0x1b0   : > { %v3816_v24 = vpop.permute.xlu1 %1418  ;;  %1859 = vperm.xlu0 %2250, %v1357_v11   ;;  %v1323_v7 = vmul.f32 %v3665_v20, %v4548_v47 }
 0x1b1   : > { %1824 = vperm.xlu1 %2251, %v1350_v39   ;;  %v1310_v39 = vmul.f32 %v3639_v33, %v4543_v16  ;;  %v1264_v33 = vld [vmem:[%s3683_s25 + $0x100] sm:$0xff] }
 0x1b2   : > { %v1371_v16 = vsub.f32 %v1275_v18, %v1323_v7  ;;  %v1324_v7 = vmul.f32 %v3707_v21, %v3621_v35  ;;  %v1276_v18 = vld [vmem:[%s3683_s25 + $0x160] sm:$0xff] }
 0x1b3   : > { %v3821_v45 = vpop.permute.xlu0 %1463  ;;  %v1358_v8 = vsub.f32 %v1262_v52, %v1310_v39  ;;  %v4550_v39 = vld [vmem:[#allocation42_spill] sm:$0xff] }
 0x1b4   : > { %v3826_v49 = vpop.permute.xlu1 %1428  ;;  %1869 = vperm.xlu0 %2250, %v1359_v42   ;;  %v1325_v52 = vmul.f32 %v3673_v50, %v4550_v39 }
 0x1b5   : > { %1834 = vperm.xlu1 %2251, %v1352_v60   ;;  %v1312_v60 = vmul.f32 %v3651_v59, %v4545_v43  ;;  %v1266_v59 = vld [vmem:[%s3683_s25 + $0x110] sm:$0xff] }
 0x1b6   : > { %v1373_v43 = vsub.f32 %v1277_v1, %v1325_v52 }
 0x1b7   : > { %v3831_v48 = vpop.permute.xlu0 %1473  ;;  %v1360_v51 = vsub.f32 %v1264_v33, %v1312_v60  ;;  %v1327_v60 = vmul.f32 %v3690_v38, %v3615_v5 }
 0x1b8   : > { %v3836_v61 = vpop.permute.xlu1 %1438  ;;  %1879 = vperm.xlu0 %2250, %v1361_v9  }
 0x1b9   : > { %1844 = vperm.xlu1 %2251, %v1354_v26   ;;  %v1314_v26 = vmul.f32 %v3659_v56, %v4547_v37  ;;  %v1268_v56 = vld [vmem:[%s3683_s25 + $0x120] sm:$0xff] }
 0x1bb   : > { %v3841_v11 = vpop.permute.xlu0 %1483  ;;  %v1362_v58 = vsub.f32 %v1266_v59, %v1314_v26  ;;  %v4553_v59 = vld [vmem:[#allocation43_spill] sm:$0xff] }
 0x1bc   : > { %v3846_v57 = vpop.permute.xlu1 %1448  ;;  %1889 = vperm.xlu0 %2250, %v1363_v53   ;;  %v1322_v5 = vmul.f32 %v3700_v28, %v4553_v59  ;;  %v1326_v28 = vmul.f32 %v3716_v15, %v3636_v0  ;;  %v2351_v59 = vld [vmem:[%s2489_s18 + $0x38] sm:$0xff] }
 0x1bd   : > { %1854 = vperm.xlu1 %2251, %v1356_v4   ;;  %v1316_v4 = vmul.f32 %v3667_v12, %v4549_v46  ;;  %v1270_v12 = vld [vmem:[%s3683_s25 + $0x130] sm:$0xff] }
 0x1bf   : > { %v3851_v42 = vpop.permute.xlu0 %1493  ;;  %v1364_v20 = vsub.f32 %v1268_v56, %v1316_v4  ;;  %v1372_v4 = vsub.f32 %v1276_v18, %v1324_v7 }
 0x1c0   : > { %v3856_v30 = vpop.permute.xlu1 %1458  ;;  %1899 = vperm.xlu0 %2250, %v1365_v41  }
 0x1c1   : > { %1864 = vperm.xlu1 %2251, %v1358_v8   ;;  %v1318_v8 = vmul.f32 %v3675_v2, %v4551_v36  ;;  %v1272_v2 = vld [vmem:[%s3683_s25 + $0x140] sm:$0xff] }
 0x1c2   : > { %v1368_v26 = vsub.f32 %v1272_v2, %v1320_v44 }
 0x1c3   : > { %v3861_v9 = vpop.permute.xlu0 %1503  ;;  %v1366_v50 = vsub.f32 %v1270_v12, %v1318_v8 }
 0x1c4   : > { %v3866_v10 = vpop.permute.xlu1 %1468  ;;  %1909 = vperm.xlu0 %2250, %v1367_v40   ;;  %v1279_v40 = vld [vmem:[%s3683_s25 + $0x178] sm:$0xff] }
 0x1c5   : > { %1874 = vperm.xlu1 %2251, %v1360_v51   ;;  %v1375_v32 = vsub.f32 %v1279_v40, %v1327_v60 }
 0x1c7   : > { %v3871_v53 = vpop.permute.xlu0 %1513 }
 0x1c8   : > { %v3876_v3 = vpop.permute.xlu1 %1478  ;;  %1919 = vperm.xlu0 %2250, %v1369_v14   ;;  %v1274_v14 = vld [vmem:[%s3683_s25 + $0x150] sm:$0xff] }
 0x1c9   : > { %1884 = vperm.xlu1 %2251, %v1362_v58   ;;  %v1370_v47 = vsub.f32 %v1274_v14, %v1322_v5  ;;  %v1623_v5 = vmul.f32 %v2351_v59, %v3766_v22 }
 0x1cb   : > { %v3881_v41 = vpop.permute.xlu0 %1523 }
 0x1cc   : > { %v3886_v29 = vpop.permute.xlu1 %1488  ;;  %1929 = vperm.xlu0 %2250, %v1371_v16   ;;  %v1278_v16 = vld [vmem:[%s3683_s25 + $0x170] sm:$0xff] }
 0x1cd   : > { %1894 = vperm.xlu1 %2251, %v1364_v20   ;;  %v1374_v35 = vsub.f32 %v1278_v16, %v1326_v28  ;;  %v2353_v16 = vld [vmem:[%s2489_s18 + $0x58] sm:$0xff] }
 0x1cf   : > { %v3891_v33 = vpop.permute.xlu0 %1533 }
 0x1d0   : > { %v3896_v51 = vpop.permute.xlu1 %1498  ;;  %1939 = vperm.xlu0 %2250, %v1373_v43   ;;  %v2348_v43 = vld [vmem:[%s2489_s18 + $0x10] sm:$0xff] }
 0x1d1   : > { %1904 = vperm.xlu1 %2251, %v1366_v50   ;;  %v1618_v60 = vmul.f32 %v2348_v43, %v3747_v19  ;;  %v2349_v50 = vld [vmem:[%s2489_s18 + $0x18] sm:$0xff] }
 0x1d2   : > { %v1619_v40 = vmul.f32 %v2349_v50, %v3747_v19 }
 0x1d3   : > { %v3899_v37 = vpop.permute.xlu0 %1543 }
 0x1d4   : > { %v3903_v38 = vpop.permute.xlu1 %1508  ;;  %1949 = vperm.xlu0 %2250, %v1375_v32  }
 0x1d5   : > { %1914 = vperm.xlu1 %2251, %v1368_v26   ;;  %v2350_v26 = vld [vmem:[%s2489_s18 + $0x30] sm:$0xff] }
 0x1d6   : > { %v1622_v19 = vmul.f32 %v2350_v26, %v3766_v22  ;;  %v1627_v22 = vmul.f32 %v2353_v16, %v3786_v63 }
 0x1d7   : > { %v3906_v31 = vpop.permute.xlu0 %1553 }
 0x1d8   : > { %v3910_v58 = vpop.permute.xlu1 %1518 }
 0x1d9   : > { %1924 = vperm.xlu1 %2251, %v1370_v47  }
 0x1db   : > { %v3913_v46 = vpop.permute.xlu0 %1563 }
 0x1dc   : > { %v3917_v56 = vpop.permute.xlu1 %1528 }
 0x1dd   : > { %1934 = vperm.xlu1 %2251, %v1372_v4   ;;  %v2352_v4 = vld [vmem:[%s2489_s18 + $0x50] sm:$0xff] }
 0x1de   : > { %v1626_v28 = vmul.f32 %v2352_v4, %v3786_v63  ;;  %v2356_v63 = vld [vmem:[%s2489_s18] sm:$0xff] }
 0x1df   : > { %v3920_v39 = vpop.permute.xlu0 %1573  ;;  %v1616_v26 = vmul.f32 %v2356_v63, %v3771_v54 }
 0x1e0   : > { %v3922_v21 = vpop.permute.xlu1 %1538 }
 0x1e1   : > { %1944 = vperm.xlu1 %2251, %v1374_v35  }
 0x1e3   : > { %v3924_v52 = vpop.permute.xlu0 %1583 }
 0x1e4   : > { %v3926_v20 = vpop.permute.xlu1 %1548 }
 0x1e7   : > { %v3928_v1 = vpop.permute.xlu0 %1593 }
 0x1e8   : > { %v3930_v0 = vpop.permute.xlu1 %1558 }
 0x1eb   : > { %v3932_v15 = vpop.permute.xlu0 %1603 }
 0x1ec   : > { %v3934_v36 = vpop.permute.xlu1 %1568 }
 0x1ef   : > { %v3936_v8 = vpop.permute.xlu0 %1613 }
 0x1f0   : > { %v3938_v12 = vpop.permute.xlu1 %1578 }
 0x1f3   : > { %v1720_v17 = vpop.permute.xlu0 %1719 }
 0x1f4   : > { %v3951_v44 = vpop.permute.xlu1 %1588  ;;  %v1954_v2 = vadd.f32 %v1720_v17, %v1618_v60  ;;  %v1955_v32 = vadd.f32 %v1720_v17, %v1619_v40  ;;  %v2354_v40 = vld [vmem:[%s2489_s18 + $0x70] sm:$0xff] }
 0x1f5   : > { %v1630_v17 = vmul.f32 %v2354_v40, %v3806_v55 }
 0x1f6   : > { %2050 = vst [vmem:[%s3949_s28 + $0x10] sm:$0xff] %v1954_v2  ;;  %2051 = vst.msk [vmem:[%s3949_s28 + $0x18] sm:$0xff] %vm319_vm0, %v1955_v32  ;;  %v2355_v2 = vld [vmem:[%s2489_s18 + $0x78] sm:$0xff] }
 0x1f7   : > { %v1730_v14 = vpop.permute.xlu0 %1729  ;;  %v1631_v32 = vmul.f32 %v2355_v2, %v3806_v55 }
 0x1f8   : > { %v3960_v47 = vpop.permute.xlu1 %1598  ;;  %v1958_v7 = vadd.f32 %v1730_v14, %v1622_v19  ;;  %v1959_v18 = vadd.f32 %v1730_v14, %v1623_v5  ;;  %v2357_v19 = vld [vmem:[%s2489_s18 + $0x8] sm:$0xff] }
 0x1f9   : > { %v1617_v59 = vmul.f32 %v2357_v19, %v3771_v54  ;;  %v2360_v54 = vld [vmem:[%s2489_s18 + $0x20] sm:$0xff]  ;;  %v2362_v19 = vld [vmem:[%s2489_s18 + $0xb0] sm:$0xff] }
 0x1fa   : > { %2054 = vst [vmem:[%s3949_s28 + $0x30] sm:$0xff] %v1958_v7  ;;  %2055 = vst.msk [vmem:[%s3949_s28 + $0x38] sm:$0xff] %vm319_vm0, %v1959_v18 }
 0x1fb   : > { %v1740_v35 = vpop.permute.xlu0 %1739 }
 0x1fc   : > { %v3969_v43 = vpop.permute.xlu1 %1608  ;;  %v1962_v60 = vadd.f32 %v1740_v35, %v1626_v28  ;;  %v1963_v50 = vadd.f32 %v1740_v35, %v1627_v22  ;;  %v2358_v28 = vld [vmem:[%s2489_s18 + $0x90] sm:$0xff]  ;;  %v2359_v22 = vld [vmem:[%s2489_s18 + $0x98] sm:$0xff] }
 0x1fd   : > { %v1634_v16 = vmul.f32 %v2358_v28, %v3781_v25  ;;  %v1635_v35 = vmul.f32 %v2359_v22, %v3781_v25 }
 0x1fe   : > { %2058 = vst [vmem:[%s3949_s28 + $0x50] sm:$0xff] %v1962_v60  ;;  %2059 = vst.msk [vmem:[%s3949_s28 + $0x58] sm:$0xff] %vm319_vm0, %v1963_v50  ;;  %v1620_v60 = vmul.f32 %v2360_v54, %v3758_v23  ;;  %v2361_v50 = vld [vmem:[%s2489_s18 + $0x28] sm:$0xff]  ;;  %v2366_v54 = vld [vmem:[%s2489_s18 + $0xd0] sm:$0xff] }
 0x1ff   : > { %v1750_v5 = vpop.permute.xlu0 %1749  ;;  %v1621_v40 = vmul.f32 %v2361_v50, %v3758_v23  ;;  %v2364_v23 = vld [vmem:[%s2489_s18 + $0x40] sm:$0xff]  ;;  %v2367_v50 = vld [vmem:[%s2489_s18 + $0xd8] sm:$0xff] }
 0x200   : > { %v1715_v14 = vpop.permute.xlu1 %1714  ;;  %v1966_v7 = vadd.f32 %v1750_v5, %v1630_v17  ;;  %v1967_v18 = vadd.f32 %v1750_v5, %v1631_v32  ;;  %v2363_v5 = vld [vmem:[%s2489_s18 + $0xb8] sm:$0xff] }
 0x201   : > { %v1952_v55 = vadd.f32 %v1715_v14, %v1616_v26  ;;  %v1953_v4 = vadd.f32 %v1715_v14, %v1617_v59  ;;  %v1638_v59 = vmul.f32 %v2362_v19, %v3791_v27  ;;  %v1639_v14 = vmul.f32 %v2363_v5, %v3791_v27  ;;  %v2370_v5 = vld [vmem:[%s2489_s18 + $0xf0] sm:$0xff] }
 0x202   : > { %2062 = vst [vmem:[%s3949_s28 + $0x70] sm:$0xff] %v1966_v7  ;;  %2063 = vst.msk [vmem:[%s3949_s28 + $0x78] sm:$0xff] %vm319_vm0, %v1967_v18  ;;  %v1624_v7 = vmul.f32 %v2364_v23, %v3776_v13  ;;  %v2365_v18 = vld [vmem:[%s2489_s18 + $0x48] sm:$0xff]  ;;  %v2371_v23 = vld [vmem:[%s2489_s18 + $0xf8] sm:$0xff] }
 0x203   : > { %2048 = vst [vmem:[%s3949_s28] sm:$0xff] %v1952_v55  ;;  %2049 = vst.msk [vmem:[%s3949_s28 + $0x8] sm:$0xff] %vm319_vm0, %v1953_v4  ;;  %v1760_v17 = vpop.permute.xlu0 %1759  ;;  %v1625_v55 = vmul.f32 %v2365_v18, %v3776_v13  ;;  %v2368_v13 = vld [vmem:[%s2489_s18 + $0x60] sm:$0xff] }
 0x204   : > { %v1725_v25 = vpop.permute.xlu1 %1724  ;;  %v1970_v2 = vadd.f32 %v1760_v17, %v1634_v16  ;;  %v1971_v32 = vadd.f32 %v1760_v17, %v1635_v35  ;;  %v1628_v17 = vmul.f32 %v2368_v13, %v3796_v6 }
 0x205   : > { %v1956_v63 = vadd.f32 %v1725_v25, %v1620_v60  ;;  %v1957_v26 = vadd.f32 %v1725_v25, %v1621_v40  ;;  %v1642_v60 = vmul.f32 %v2366_v54, %v3801_v34  ;;  %v1643_v40 = vmul.f32 %v2367_v50, %v3801_v34  ;;  %v2369_v25 = vld [vmem:[%s2489_s18 + $0x68] sm:$0xff]  ;;  %v2374_v54 = vld [vmem:[%s2489_s18 + $0x110] sm:$0xff]  ;;  %v2375_v50 = vld [vmem:[%s2489_s18 + $0x118] sm:$0xff] }
 0x206   : > { %2066 = vst [vmem:[%s3949_s28 + $0x90] sm:$0xff] %v1970_v2  ;;  %2067 = vst.msk [vmem:[%s3949_s28 + $0x98] sm:$0xff] %vm319_vm0, %v1971_v32  ;;  %v1629_v2 = vmul.f32 %v2369_v25, %v3796_v6  ;;  %v2372_v6 = vld [vmem:[%s2489_s18 + $0x80] sm:$0xff] }
 0x207   : > { %2052 = vst [vmem:[%s3949_s28 + $0x20] sm:$0xff] %v1956_v63  ;;  %2053 = vst.msk [vmem:[%s3949_s28 + $0x28] sm:$0xff] %vm319_vm0, %v1957_v26  ;;  %v1770_v4 = vpop.permute.xlu0 %1769  ;;  %v1632_v18 = vmul.f32 %v2372_v6, %v3816_v24 }
 0x208   : > { %v1735_v27 = vpop.permute.xlu1 %1734  ;;  %v1974_v28 = vadd.f32 %v1770_v4, %v1638_v59  ;;  %v1975_v16 = vadd.f32 %v1770_v4, %v1639_v14  ;;  %v1646_v14 = vmul.f32 %v2370_v5, %v3811_v62  ;;  %v2379_v5 = vld [vmem:[%s2489_s18 + $0x138] sm:$0xff] }
 0x209   : > { %v1960_v22 = vadd.f32 %v1735_v27, %v1624_v7  ;;  %v1961_v35 = vadd.f32 %v1735_v27, %v1625_v55  ;;  %v1647_v7 = vmul.f32 %v2371_v23, %v3811_v62  ;;  %v2373_v55 = vld [vmem:[%s2489_s18 + $0x88] sm:$0xff] }
 0x20a   : > { %2070 = vst [vmem:[%s3949_s28 + $0xb0] sm:$0xff] %v1974_v28  ;;  %2071 = vst.msk [vmem:[%s3949_s28 + $0xb8] sm:$0xff] %vm319_vm0, %v1975_v16  ;;  %v1633_v4 = vmul.f32 %v2373_v55, %v3816_v24  ;;  %v2376_v24 = vld [vmem:[%s2489_s18 + $0xa0] sm:$0xff] }
 0x20b   : > { %2056 = vst [vmem:[%s3949_s28 + $0x40] sm:$0xff] %v1960_v22  ;;  %2057 = vst.msk [vmem:[%s3949_s28 + $0x48] sm:$0xff] %vm319_vm0, %v1961_v35  ;;  %v1780_v32 = vpop.permute.xlu0 %1779  ;;  %v1636_v13 = vmul.f32 %v2376_v24, %v3826_v49 }
 0x20c   : > { %v1745_v34 = vpop.permute.xlu1 %1744  ;;  %v1978_v63 = vadd.f32 %v1780_v32, %v1642_v60  ;;  %v1979_v26 = vadd.f32 %v1780_v32, %v1643_v40  ;;  %v1650_v60 = vmul.f32 %v2374_v54, %v3821_v45  ;;  %v1651_v40 = vmul.f32 %v2375_v50, %v3821_v45 }
 0x20d   : > { %v1964_v19 = vadd.f32 %v1745_v34, %v1628_v17  ;;  %v1965_v59 = vadd.f32 %v1745_v34, %v1629_v2  ;;  %v2377_v17 = vld [vmem:[%s2489_s18 + $0xa8] sm:$0xff] }
 0x20e   : > { %2074 = vst [vmem:[%s3949_s28 + $0xd0] sm:$0xff] %v1978_v63  ;;  %2075 = vst.msk [vmem:[%s3949_s28 + $0xd8] sm:$0xff] %vm319_vm0, %v1979_v26  ;;  %v1637_v25 = vmul.f32 %v2377_v17, %v3826_v49  ;;  %v2380_v49 = vld [vmem:[%s2489_s18 + $0xc0] sm:$0xff] }
 0x20f   : > { %2060 = vst [vmem:[%s3949_s28 + $0x60] sm:$0xff] %v1964_v19  ;;  %2061 = vst.msk [vmem:[%s3949_s28 + $0x68] sm:$0xff] %vm319_vm0, %v1965_v59  ;;  %v1790_v27 = vpop.permute.xlu0 %1789  ;;  %v2378_v19 = vld [vmem:[%s2489_s18 + $0x130] sm:$0xff]  ;;  %v1640_v23 = vmul.f32 %v2380_v49, %v3836_v61 }
 0x210   : > { %v1755_v62 = vpop.permute.xlu1 %1754  ;;  %v1982_v28 = vadd.f32 %v1790_v27, %v1646_v14  ;;  %v1983_v16 = vadd.f32 %v1790_v27, %v1647_v7  ;;  %v1654_v59 = vmul.f32 %v2378_v19, %v3831_v48  ;;  %v1655_v14 = vmul.f32 %v2379_v5, %v3831_v48  ;;  %v2381_v7 = vld [vmem:[%s2489_s18 + $0xc8] sm:$0xff] }
 0x211   : > { %v1968_v22 = vadd.f32 %v1755_v62, %v1632_v18  ;;  %v1969_v35 = vadd.f32 %v1755_v62, %v1633_v4  ;;  %v1641_v6 = vmul.f32 %v2381_v7, %v3836_v61  ;;  %v2384_v61 = vld [vmem:[%s2489_s18 + $0xe0] sm:$0xff]  ;;  %v2390_v7 = vld [vmem:[%s2489_s18 + $0x190] sm:$0xff] }
 0x212   : > { %2078 = vst [vmem:[%s3949_s28 + $0xf0] sm:$0xff] %v1982_v28  ;;  %2079 = vst.msk [vmem:[%s3949_s28 + $0xf8] sm:$0xff] %vm319_vm0, %v1983_v16  ;;  %v2382_v28 = vld [vmem:[%s2489_s18 + $0x150] sm:$0xff]  ;;  %v1644_v54 = vmul.f32 %v2384_v61, %v3846_v57 }
 0x213   : > { %2064 = vst [vmem:[%s3949_s28 + $0x80] sm:$0xff] %v1968_v22  ;;  %2065 = vst.msk [vmem:[%s3949_s28 + $0x88] sm:$0xff] %vm319_vm0, %v1969_v35  ;;  %v1800_v2 = vpop.permute.xlu0 %1799  ;;  %v1658_v16 = vmul.f32 %v2382_v28, %v3841_v11  ;;  %v2383_v22 = vld [vmem:[%s2489_s18 + $0x158] sm:$0xff]  ;;  %v2394_v61 = vld [vmem:[%s2489_s18 + $0x1b0] sm:$0xff] }
 0x214   : > { %v1765_v45 = vpop.permute.xlu1 %1764  ;;  %v1986_v32 = vadd.f32 %v1800_v2, %v1650_v60  ;;  %v1987_v34 = vadd.f32 %v1800_v2, %v1651_v40  ;;  %v1659_v35 = vmul.f32 %v2383_v22, %v3841_v11  ;;  %v2385_v60 = vld [vmem:[%s2489_s18 + $0xe8] sm:$0xff]  ;;  %v2386_v2 = vld [vmem:[%s2489_s18 + $0x170] sm:$0xff] }
 0x215   : > { %v1972_v63 = vadd.f32 %v1765_v45, %v1636_v13  ;;  %v1973_v26 = vadd.f32 %v1765_v45, %v1637_v25  ;;  %v1645_v50 = vmul.f32 %v2385_v60, %v3846_v57  ;;  %v1662_v45 = vmul.f32 %v2386_v2, %v3851_v42  ;;  %v2388_v57 = vld [vmem:[%s2489_s18 + $0x100] sm:$0xff]  ;;  %v2395_v60 = vld [vmem:[%s2489_s18 + $0x1b8] sm:$0xff] }
 0x216   : > { %2082 = vst [vmem:[%s3949_s28 + $0x110] sm:$0xff] %v1986_v32  ;;  %2083 = vst.msk [vmem:[%s3949_s28 + $0x118] sm:$0xff] %vm319_vm0, %v1987_v34  ;;  %v2387_v32 = vld [vmem:[%s2489_s18 + $0x178] sm:$0xff] }
 0x217   : > { %2068 = vst [vmem:[%s3949_s28 + $0xa0] sm:$0xff] %v1972_v63  ;;  %2069 = vst.msk [vmem:[%s3949_s28 + $0xa8] sm:$0xff] %vm319_vm0, %v1973_v26  ;;  %v1810_v18 = vpop.permute.xlu0 %1809  ;;  %v1663_v34 = vmul.f32 %v2387_v32, %v3851_v42  ;;  %v1648_v63 = vmul.f32 %v2388_v57, %v3856_v30  ;;  %v2389_v26 = vld [vmem:[%s2489_s18 + $0x108] sm:$0xff]  ;;  %v2398_v32 = vld [vmem:[%s2489_s18 + $0x1d0] sm:$0xff] }
 0x218   : > { %v1775_v48 = vpop.permute.xlu1 %1774  ;;  %v1990_v55 = vadd.f32 %v1810_v18, %v1654_v59  ;;  %v1991_v4 = vadd.f32 %v1810_v18, %v1655_v14  ;;  %v1649_v19 = vmul.f32 %v2389_v26, %v3856_v30  ;;  %v2391_v18 = vld [vmem:[%s2489_s18 + $0x198] sm:$0xff]  ;;  %v2392_v30 = vld [vmem:[%s2489_s18 + $0x120] sm:$0xff] }
 0x219   : > { %v1976_v27 = vadd.f32 %v1775_v48, %v1640_v23  ;;  %v1977_v62 = vadd.f32 %v1775_v48, %v1641_v6  ;;  %v1666_v6 = vmul.f32 %v2390_v7, %v3861_v9  ;;  %v1667_v48 = vmul.f32 %v2391_v18, %v3861_v9  ;;  %v2399_v57 = vld [vmem:[%s2489_s18 + $0x1d8] sm:$0xff]  ;;  %v2402_v7 = vld [vmem:[%s2489_s18 + $0x1f0] sm:$0xff] }
 0x21a   : > { %2086 = vst [vmem:[%s3949_s28 + $0x130] sm:$0xff] %v1990_v55  ;;  %2087 = vst.msk [vmem:[%s3949_s28 + $0x138] sm:$0xff] %vm319_vm0, %v1991_v4  ;;  %v1652_v55 = vmul.f32 %v2392_v30, %v3866_v10  ;;  %v2393_v4 = vld [vmem:[%s2489_s18 + $0x128] sm:$0xff]  ;;  %v2403_v18 = vld [vmem:[%s2489_s18 + $0x1f8] sm:$0xff] }
 0x21b   : > { %2072 = vst [vmem:[%s3949_s28 + $0xc0] sm:$0xff] %v1976_v27  ;;  %2073 = vst.msk [vmem:[%s3949_s28 + $0xc8] sm:$0xff] %vm319_vm0, %v1977_v62  ;;  %v1820_v40 = vpop.permute.xlu0 %1819  ;;  %v1653_v27 = vmul.f32 %v2393_v4, %v3866_v10  ;;  %v2396_v10 = vld [vmem:[%s2489_s18 + $0x140] sm:$0xff] }
 0x21c   : > { %v1785_v11 = vpop.permute.xlu1 %1784  ;;  %v1994_v24 = vadd.f32 %v1820_v40, %v1658_v16  ;;  %v1995_v13 = vadd.f32 %v1820_v40, %v1659_v35  ;;  %v1656_v40 = vmul.f32 %v2396_v10, %v3876_v3 }
 0x21d   : > { %v1980_v17 = vadd.f32 %v1785_v11, %v1644_v54  ;;  %v1981_v25 = vadd.f32 %v1785_v11, %v1645_v50  ;;  %v1670_v54 = vmul.f32 %v2394_v61, %v3871_v53  ;;  %v1671_v50 = vmul.f32 %v2395_v60, %v3871_v53  ;;  %v2397_v11 = vld [vmem:[%s2489_s18 + $0x148] sm:$0xff]  ;;  %v2407_v61 = vld [vmem:[%s2489_s18 + $0x218] sm:$0xff] }
 0x21e   : > { %2090 = vst [vmem:[%s3949_s28 + $0x150] sm:$0xff] %v1994_v24  ;;  %2091 = vst.msk [vmem:[%s3949_s28 + $0x158] sm:$0xff] %vm319_vm0, %v1995_v13  ;;  %v1657_v24 = vmul.f32 %v2397_v11, %v3876_v3  ;;  %v2400_v3 = vld [vmem:[%s2489_s18 + $0x160] sm:$0xff] }
 0x21f   : > { %2076 = vst [vmem:[%s3949_s28 + $0xe0] sm:$0xff] %v1980_v17  ;;  %2077 = vst.msk [vmem:[%s3949_s28 + $0xe8] sm:$0xff] %vm319_vm0, %v1981_v25  ;;  %v1830_v59 = vpop.permute.xlu0 %1829  ;;  %v1660_v26 = vmul.f32 %v2400_v3, %v3886_v29 }
 0x220   : > { %v1795_v42 = vpop.permute.xlu1 %1794  ;;  %v1998_v5 = vadd.f32 %v1830_v59, %v1662_v45  ;;  %v1999_v14 = vadd.f32 %v1830_v59, %v1663_v34  ;;  %v1674_v34 = vmul.f32 %v2398_v32, %v3881_v41 }
 0x221   : > { %v1984_v49 = vadd.f32 %v1795_v42, %v1648_v63  ;;  %v1985_v23 = vadd.f32 %v1795_v42, %v1649_v19  ;;  %v1675_v63 = vmul.f32 %v2399_v57, %v3881_v41  ;;  %v2401_v19 = vld [vmem:[%s2489_s18 + $0x168] sm:$0xff] }
 0x222   : > { %2094 = vst [vmem:[%s3949_s28 + $0x170] sm:$0xff] %v1998_v5  ;;  %2095 = vst.msk [vmem:[%s3949_s28 + $0x178] sm:$0xff] %vm319_vm0, %v1999_v14  ;;  %v1661_v59 = vmul.f32 %v2401_v19, %v3886_v29  ;;  %v2404_v29 = vld [vmem:[%s2489_s18 + $0x180] sm:$0xff] }
 0x223   : > { %2080 = vst [vmem:[%s3949_s28 + $0x100] sm:$0xff] %v1984_v49  ;;  %2081 = vst.msk [vmem:[%s3949_s28 + $0x108] sm:$0xff] %vm319_vm0, %v1985_v23  ;;  %v1840_v62 = vpop.permute.xlu0 %1839  ;;  %v1664_v30 = vmul.f32 %v2404_v29, %v3896_v51 }
 0x224   : > { %v1805_v9 = vpop.permute.xlu1 %1804  ;;  %v2002_v28 = vadd.f32 %v1840_v62, %v1666_v6  ;;  %v2003_v16 = vadd.f32 %v1840_v62, %v1667_v48  ;;  %v1678_v6 = vmul.f32 %v2402_v7, %v3891_v33  ;;  %v1679_v48 = vmul.f32 %v2403_v18, %v3891_v33 }
 0x225   : > { %v1988_v22 = vadd.f32 %v1805_v9, %v1652_v55  ;;  %v1989_v35 = vadd.f32 %v1805_v9, %v1653_v27  ;;  %v2405_v55 = vld [vmem:[%s2489_s18 + $0x188] sm:$0xff] }
 0x226   : > { %2098 = vst [vmem:[%s3949_s28 + $0x190] sm:$0xff] %v2002_v28  ;;  %2099 = vst.msk [vmem:[%s3949_s28 + $0x198] sm:$0xff] %vm319_vm0, %v2003_v16  ;;  %v1665_v4 = vmul.f32 %v2405_v55, %v3896_v51  ;;  %v2408_v51 = vld [vmem:[%s2489_s18 + $0x1a0] sm:$0xff]  ;;  %v2418_v55 = vld [vmem:[%s2489_s18 + $0x270] sm:$0xff] }
 0x227   : > { %2084 = vst [vmem:[%s3949_s28 + $0x120] sm:$0xff] %v1988_v22  ;;  %2085 = vst.msk [vmem:[%s3949_s28 + $0x128] sm:$0xff] %vm319_vm0, %v1989_v35  ;;  %v1850_v13 = vpop.permute.xlu0 %1849  ;;  %v2406_v22 = vld [vmem:[%s2489_s18 + $0x210] sm:$0xff]  ;;  %v1668_v60 = vmul.f32 %v2408_v51, %v3903_v38 }
 0x228   : > { %v1815_v53 = vpop.permute.xlu1 %1814  ;;  %v2006_v17 = vadd.f32 %v1850_v13, %v1670_v54  ;;  %v2007_v25 = vadd.f32 %v1850_v13, %v1671_v50  ;;  %v1682_v35 = vmul.f32 %v2406_v22, %v3899_v37  ;;  %v1683_v54 = vmul.f32 %v2407_v61, %v3899_v37  ;;  %v2409_v50 = vld [vmem:[%s2489_s18 + $0x1a8] sm:$0xff]  ;;  %v2422_v51 = vld [vmem:[%s2489_s18 + $0x290] sm:$0xff] }
 0x229   : > { %v1992_v2 = vadd.f32 %v1815_v53, %v1656_v40  ;;  %v1993_v45 = vadd.f32 %v1815_v53, %v1657_v24  ;;  %v1669_v10 = vmul.f32 %v2409_v50, %v3903_v38  ;;  %v2412_v38 = vld [vmem:[%s2489_s18 + $0x1c0] sm:$0xff]  ;;  %v2423_v50 = vld [vmem:[%s2489_s18 + $0x298] sm:$0xff] }
 0x22a   : > { %2102 = vst [vmem:[%s3949_s28 + $0x1b0] sm:$0xff] %v2006_v17  ;;  %2103 = vst.msk [vmem:[%s3949_s28 + $0x1b8] sm:$0xff] %vm319_vm0, %v2007_v25  ;;  %v2410_v17 = vld [vmem:[%s2489_s18 + $0x230] sm:$0xff]  ;;  %v1672_v32 = vmul.f32 %v2412_v38, %v3910_v58  ;;  %v2427_v38 = vld [vmem:[%s2489_s18 + $0x2b8] sm:$0xff] }
 0x22b   : > { %2088 = vst [vmem:[%s3949_s28 + $0x140] sm:$0xff] %v1992_v2  ;;  %2089 = vst.msk [vmem:[%s3949_s28 + $0x148] sm:$0xff] %vm319_vm0, %v1993_v45  ;;  %v1860_v42 = vpop.permute.xlu0 %1859  ;;  %v1686_v25 = vmul.f32 %v2410_v17, %v3906_v31  ;;  %v2411_v2 = vld [vmem:[%s2489_s18 + $0x238] sm:$0xff] }
 0x22c   : > { %v1825_v41 = vpop.permute.xlu1 %1824  ;;  %v2010_v5 = vadd.f32 %v1860_v42, %v1674_v34  ;;  %v2011_v14 = vadd.f32 %v1860_v42, %v1675_v63  ;;  %v1687_v45 = vmul.f32 %v2411_v2, %v3906_v31  ;;  %v2413_v34 = vld [vmem:[%s2489_s18 + $0x1c8] sm:$0xff]  ;;  %v2414_v42 = vld [vmem:[%s2489_s18 + $0x250] sm:$0xff] }
 0x22d   : > { %v1996_v49 = vadd.f32 %v1825_v41, %v1660_v26  ;;  %v1997_v23 = vadd.f32 %v1825_v41, %v1661_v59  ;;  %v1673_v57 = vmul.f32 %v2413_v34, %v3910_v58  ;;  %v1690_v41 = vmul.f32 %v2414_v42, %v3913_v46  ;;  %v2416_v58 = vld [vmem:[%s2489_s18 + $0x1e0] sm:$0xff]  ;;  %v2426_v2 = vld [vmem:[%s2489_s18 + $0x2b0] sm:$0xff] }
 0x22e   : > { %2106 = vst [vmem:[%s3949_s28 + $0x1d0] sm:$0xff] %v2010_v5  ;;  %2107 = vst.msk [vmem:[%s3949_s28 + $0x1d8] sm:$0xff] %vm319_vm0, %v2011_v14  ;;  %v2415_v5 = vld [vmem:[%s2489_s18 + $0x258] sm:$0xff]  ;;  %v2430_v42 = vld [vmem:[%s2489_s18 + $0x2d0] sm:$0xff] }
 0x22f   : > { %2092 = vst [vmem:[%s3949_s28 + $0x160] sm:$0xff] %v1996_v49  ;;  %2093 = vst.msk [vmem:[%s3949_s28 + $0x168] sm:$0xff] %vm319_vm0, %v1997_v23  ;;  %v1870_v27 = vpop.permute.xlu0 %1869  ;;  %v1691_v14 = vmul.f32 %v2415_v5, %v3913_v46  ;;  %v1676_v49 = vmul.f32 %v2416_v58, %v3917_v56  ;;  %v2417_v23 = vld [vmem:[%s2489_s18 + $0x1e8] sm:$0xff]  ;;  %v2431_v5 = vld [vmem:[%s2489_s18 + $0x2d8] sm:$0xff] }
 0x230   : > { %v1835_v33 = vpop.permute.xlu1 %1834  ;;  %v2014_v62 = vadd.f32 %v1870_v27, %v1678_v6  ;;  %v2015_v9 = vadd.f32 %v1870_v27, %v1679_v48  ;;  %v1677_v7 = vmul.f32 %v2417_v23, %v3917_v56  ;;  %v2419_v27 = vld [vmem:[%s2489_s18 + $0x278] sm:$0xff]  ;;  %v2420_v56 = vld [vmem:[%s2489_s18 + $0x200] sm:$0xff] }
 0x231   : > { %v2000_v28 = vadd.f32 %v1835_v33, %v1664_v30  ;;  %v2001_v16 = vadd.f32 %v1835_v33, %v1665_v4  ;;  %v1694_v4 = vmul.f32 %v2418_v55, %v3920_v39  ;;  %v1695_v33 = vmul.f32 %v2419_v27, %v3920_v39  ;;  %v2435_v55 = vld [vmem:[%s2489_s18 + $0x2f8] sm:$0xff] }
 0x232   : > { %2110 = vst [vmem:[%s3949_s28 + $0x1f0] sm:$0xff] %v2014_v62  ;;  %2111 = vst.msk [vmem:[%s3949_s28 + $0x1f8] sm:$0xff] %vm319_vm0, %v2015_v9  ;;  %v1680_v62 = vmul.f32 %v2420_v56, %v3922_v21  ;;  %v2421_v9 = vld [vmem:[%s2489_s18 + $0x208] sm:$0xff] }
 0x233   : > { %2096 = vst [vmem:[%s3949_s28 + $0x180] sm:$0xff] %v2000_v28  ;;  %2097 = vst.msk [vmem:[%s3949_s28 + $0x188] sm:$0xff] %vm319_vm0, %v2001_v16  ;;  %v1880_v40 = vpop.permute.xlu0 %1879  ;;  %v1681_v28 = vmul.f32 %v2421_v9, %v3922_v21  ;;  %v2424_v21 = vld [vmem:[%s2489_s18 + $0x220] sm:$0xff] }
 0x234   : > { %v1845_v37 = vpop.permute.xlu1 %1844  ;;  %v2018_v11 = vadd.f32 %v1880_v40, %v1682_v35  ;;  %v2019_v24 = vadd.f32 %v1880_v40, %v1683_v54  ;;  %v1684_v40 = vmul.f32 %v2424_v21, %v3926_v20  ;;  %v2441_v21 = vld [vmem:[%s2489_s18 + $0x2c8] sm:$0xff] }
 0x235   : > { %v2004_v13 = vadd.f32 %v1845_v37, %v1668_v60  ;;  %v2005_v53 = vadd.f32 %v1845_v37, %v1669_v10  ;;  %v1698_v60 = vmul.f32 %v2422_v51, %v3924_v52  ;;  %v1699_v10 = vmul.f32 %v2423_v50, %v3924_v52  ;;  %v2425_v37 = vld [vmem:[%s2489_s18 + $0x228] sm:$0xff]  ;;  %v2440_v50 = vld [vmem:[%s2489_s18 + $0x2c0] sm:$0xff] }
 0x236   : > { %2114 = vst [vmem:[%s3949_s28 + $0x210] sm:$0xff] %v2018_v11  ;;  %2115 = vst.msk [vmem:[%s3949_s28 + $0x218] sm:$0xff] %vm319_vm0, %v2019_v24  ;;  %v1685_v11 = vmul.f32 %v2425_v37, %v3926_v20  ;;  %v2428_v20 = vld [vmem:[%s2489_s18 + $0x240] sm:$0xff] }
 0x237   : > { %2100 = vst [vmem:[%s3949_s28 + $0x1a0] sm:$0xff] %v2004_v13  ;;  %2101 = vst.msk [vmem:[%s3949_s28 + $0x1a8] sm:$0xff] %vm319_vm0, %v2005_v53  ;;  %v1890_v63 = vpop.permute.xlu0 %1889  ;;  %v1688_v34 = vmul.f32 %v2428_v20, %v3930_v0 }
 0x238   : > { %v1855_v31 = vpop.permute.xlu1 %1854  ;;  %v2022_v3 = vadd.f32 %v1890_v63, %v1686_v25  ;;  %v2023_v26 = vadd.f32 %v1890_v63, %v1687_v45  ;;  %v1702_v45 = vmul.f32 %v2426_v2, %v3928_v1 }
 0x239   : > { %v2008_v19 = vadd.f32 %v1855_v31, %v1672_v32  ;;  %v2009_v59 = vadd.f32 %v1855_v31, %v1673_v57  ;;  %v1703_v32 = vmul.f32 %v2427_v38, %v3928_v1  ;;  %v2429_v57 = vld [vmem:[%s2489_s18 + $0x248] sm:$0xff] }
 0x23a   : > { %2118 = vst [vmem:[%s3949_s28 + $0x230] sm:$0xff] %v2022_v3  ;;  %2119 = vst.msk [vmem:[%s3949_s28 + $0x238] sm:$0xff] %vm319_vm0, %v2023_v26  ;;  %v1689_v63 = vmul.f32 %v2429_v57, %v3930_v0  ;;  %v2432_v0 = vld [vmem:[%s2489_s18 + $0x260] sm:$0xff] }
 0x23b   : > { %2104 = vst [vmem:[%s3949_s28 + $0x1c0] sm:$0xff] %v2008_v19  ;;  %2105 = vst.msk [vmem:[%s3949_s28 + $0x1c8] sm:$0xff] %vm319_vm0, %v2009_v59  ;;  %v1900_v6 = vpop.permute.xlu0 %1899  ;;  %v1692_v58 = vmul.f32 %v2432_v0, %v3934_v36 }
 0x23c   : > { %v1865_v46 = vpop.permute.xlu1 %1864  ;;  %v2026_v18 = vadd.f32 %v1900_v6, %v1690_v41  ;;  %v2027_v48 = vadd.f32 %v1900_v6, %v1691_v14  ;;  %v1706_v41 = vmul.f32 %v2430_v42, %v3932_v15  ;;  %v1707_v14 = vmul.f32 %v2431_v5, %v3932_v15 }
 0x23d   : > { %v2012_v29 = vadd.f32 %v1865_v46, %v1676_v49  ;;  %v2013_v30 = vadd.f32 %v1865_v46, %v1677_v7  ;;  %v2433_v49 = vld [vmem:[%s2489_s18 + $0x268] sm:$0xff] }
 0x23e   : > { %2122 = vst [vmem:[%s3949_s28 + $0x250] sm:$0xff] %v2026_v18  ;;  %2123 = vst.msk [vmem:[%s3949_s28 + $0x258] sm:$0xff] %vm319_vm0, %v2027_v48  ;;  %v1693_v23 = vmul.f32 %v2433_v49, %v3934_v36  ;;  %v2436_v36 = vld [vmem:[%s2489_s18 + $0x280] sm:$0xff] }
 0x23f   : > { %2108 = vst [vmem:[%s3949_s28 + $0x1e0] sm:$0xff] %v2012_v29  ;;  %2109 = vst.msk [vmem:[%s3949_s28 + $0x1e8] sm:$0xff] %vm319_vm0, %v2013_v30  ;;  %v1910_v16 = vpop.permute.xlu0 %1909  ;;  %v2434_v29 = vld [vmem:[%s2489_s18 + $0x2f0] sm:$0xff]  ;;  %v1696_v27 = vmul.f32 %v2436_v36, %v3938_v12 }
 0x240   : > { %v1875_v39 = vpop.permute.xlu1 %1874  ;;  %v2030_v22 = vadd.f32 %v1910_v16, %v1694_v4  ;;  %v2031_v35 = vadd.f32 %v1910_v16, %v1695_v33  ;;  %v1710_v30 = vmul.f32 %v2434_v29, %v3936_v8  ;;  %v1711_v4 = vmul.f32 %v2435_v55, %v3936_v8  ;;  %v2437_v33 = vld [vmem:[%s2489_s18 + $0x288] sm:$0xff] }
 0x241   : > { %v2016_v61 = vadd.f32 %v1875_v39, %v1680_v62  ;;  %v2017_v54 = vadd.f32 %v1875_v39, %v1681_v28  ;;  %v1697_v56 = vmul.f32 %v2437_v33, %v3938_v12 }
 0x242   : > { %2126 = vst [vmem:[%s3949_s28 + $0x270] sm:$0xff] %v2030_v22  ;;  %2127 = vst.msk [vmem:[%s3949_s28 + $0x278] sm:$0xff] %vm319_vm0, %v2031_v35  ;;  %v2438_v22 = vld [vmem:[%s2489_s18 + $0x2a0] sm:$0xff]  ;;  %v2439_v35 = vld [vmem:[%s2489_s18 + $0x2a8] sm:$0xff] }
 0x243   : > { %2112 = vst [vmem:[%s3949_s28 + $0x200] sm:$0xff] %v2016_v61  ;;  %2113 = vst.msk [vmem:[%s3949_s28 + $0x208] sm:$0xff] %vm319_vm0, %v2017_v54  ;;  %v1920_v24 = vpop.permute.xlu0 %1919  ;;  %v1700_v12 = vmul.f32 %v2438_v22, %v3951_v44  ;;  %v1701_v61 = vmul.f32 %v2439_v35, %v3951_v44 }
 0x244   : > { %v1885_v52 = vpop.permute.xlu1 %1884  ;;  %v2034_v13 = vadd.f32 %v1920_v24, %v1698_v60  ;;  %v2035_v53 = vadd.f32 %v1920_v24, %v1699_v10  ;;  %v1704_v10 = vmul.f32 %v2440_v50, %v3960_v47  ;;  %v2442_v24 = vld [vmem:[%s2489_s18 + $0x2e0] sm:$0xff] }
 0x245   : > { %v2020_v17 = vadd.f32 %v1885_v52, %v1684_v40  ;;  %v2021_v25 = vadd.f32 %v1885_v52, %v1685_v11  ;;  %v1705_v40 = vmul.f32 %v2441_v21, %v3960_v47  ;;  %v1708_v52 = vmul.f32 %v2442_v24, %v3969_v43 }
 0x246   : > { %2130 = vst [vmem:[%s3949_s28 + $0x290] sm:$0xff] %v2034_v13  ;;  %2131 = vst.msk [vmem:[%s3949_s28 + $0x298] sm:$0xff] %vm319_vm0, %v2035_v53  ;;  %v2443_v13 = vld [vmem:[%s2489_s18 + $0x2e8] sm:$0xff] }
 0x247   : > { %2116 = vst [vmem:[%s3949_s28 + $0x220] sm:$0xff] %v2020_v17  ;;  %2117 = vst.msk [vmem:[%s3949_s28 + $0x228] sm:$0xff] %vm319_vm0, %v2021_v25  ;;  %v1930_v31 = vpop.permute.xlu0 %1929  ;;  %v1709_v53 = vmul.f32 %v2443_v13, %v3969_v43 }
 0x248   : > { %v1895_v1 = vpop.permute.xlu1 %1894  ;;  %v2038_v3 = vadd.f32 %v1930_v31, %v1702_v45  ;;  %v2039_v26 = vadd.f32 %v1930_v31, %v1703_v32 }
 0x249   : > { %v2024_v19 = vadd.f32 %v1895_v1, %v1688_v34  ;;  %v2025_v59 = vadd.f32 %v1895_v1, %v1689_v63 }
 0x24a   : > { %2134 = vst [vmem:[%s3949_s28 + $0x2b0] sm:$0xff] %v2038_v3  ;;  %2135 = vst.msk [vmem:[%s3949_s28 + $0x2b8] sm:$0xff] %vm319_vm0, %v2039_v26 }
 0x24b   : > { %2120 = vst [vmem:[%s3949_s28 + $0x240] sm:$0xff] %v2024_v19  ;;  %2121 = vst.msk [vmem:[%s3949_s28 + $0x248] sm:$0xff] %vm319_vm0, %v2025_v59  ;;  %v1940_v7 = vpop.permute.xlu0 %1939 }
 0x24c   : > { %v1905_v15 = vpop.permute.xlu1 %1904  ;;  %v2042_v6 = vadd.f32 %v1940_v7, %v1706_v41  ;;  %v2043_v46 = vadd.f32 %v1940_v7, %v1707_v14 }
 0x24d   : > { %v2028_v18 = vadd.f32 %v1905_v15, %v1692_v58  ;;  %v2029_v48 = vadd.f32 %v1905_v15, %v1693_v23 }
 0x24e   : > { %2138 = vst [vmem:[%s3949_s28 + $0x2d0] sm:$0xff] %v2042_v6  ;;  %2139 = vst.msk [vmem:[%s3949_s28 + $0x2d8] sm:$0xff] %vm319_vm0, %v2043_v46 }
 0x24f   : > { %2124 = vst [vmem:[%s3949_s28 + $0x260] sm:$0xff] %v2028_v18  ;;  %2125 = vst.msk [vmem:[%s3949_s28 + $0x268] sm:$0xff] %vm319_vm0, %v2029_v48  ;;  %v1950_v62 = vpop.permute.xlu0 %1949 }
 0x250   : > { %v1915_v9 = vpop.permute.xlu1 %1914  ;;  %v2046_v8 = vadd.f32 %v1950_v62, %v1710_v30  ;;  %v2047_v28 = vadd.f32 %v1950_v62, %v1711_v4 }
 0x251   : > { %v2032_v16 = vadd.f32 %v1915_v9, %v1696_v27  ;;  %v2033_v39 = vadd.f32 %v1915_v9, %v1697_v56 }
 0x252   : > { %2142 = vst [vmem:[%s3949_s28 + $0x2f0] sm:$0xff] %v2046_v8  ;;  %2143 = vst.msk [vmem:[%s3949_s28 + $0x2f8] sm:$0xff] %vm319_vm0, %v2047_v28 }
 0x253   : > { %2128 = vst [vmem:[%s3949_s28 + $0x280] sm:$0xff] %v2032_v16  ;;  %2129 = vst.msk [vmem:[%s3949_s28 + $0x288] sm:$0xff] %vm319_vm0, %v2033_v39 }
 0x254   : > { %v1925_v54 = vpop.permute.xlu1 %1924 }
 0x255   : > { %v2036_v51 = vadd.f32 %v1925_v54, %v1700_v12  ;;  %v2037_v60 = vadd.f32 %v1925_v54, %v1701_v61 }
 0x257   : > { %2132 = vst [vmem:[%s3949_s28 + $0x2a0] sm:$0xff] %v2036_v51  ;;  %2133 = vst.msk [vmem:[%s3949_s28 + $0x2a8] sm:$0xff] %vm319_vm0, %v2037_v60 }
 0x258   : > { %v1935_v44 = vpop.permute.xlu1 %1934 }
 0x259   : > { %v2040_v37 = vadd.f32 %v1935_v44, %v1704_v10  ;;  %v2041_v11 = vadd.f32 %v1935_v44, %v1705_v40 }
 0x25b   : > { %2136 = vst [vmem:[%s3949_s28 + $0x2c0] sm:$0xff] %v2040_v37  ;;  %2137 = vst.msk [vmem:[%s3949_s28 + $0x2c8] sm:$0xff] %vm319_vm0, %v2041_v11 }
 0x25c   : > { %v1945_v17 = vpop.permute.xlu1 %1944 }
 0x25d   : > { %v2044_v25 = vadd.f32 %v1945_v17, %v1708_v52  ;;  %v2045_v2 = vadd.f32 %v1945_v17, %v1709_v53 }
 0x25f   : > { %2140 = vst [vmem:[%s3949_s28 + $0x2e0] sm:$0xff] %v2044_v25  ;;  %2141 = vst.msk [vmem:[%s3949_s28 + $0x2e8] sm:$0xff] %vm319_vm0, %v2045_v2 }
 0x260 PF: > { %s13_s12 = sadd.s32 1, %s2450_s12  }
 0x261   : > { %p10_p4 = scmp.ge.s32.totalorder %s13_s12, 4  }
 0x263   :  { %12 = sbr.rel (!%p10_p4) target bundleno = 1 (0x1), region = 68 }

</bundles_post_ra>
